<compile_context>
chip_gen: v6e
topology: v6e:2x2x1
jax: 0.10.0
libtpu: 0.0.40
codegen_flags: <defaults>
</compile_context>

<pallas_src>
import math
import functools
import numpy as np

import jax
import jax.numpy as jnp
from jax.experimental import pallas as pl
from jax.experimental.pallas import tpu as pltpu

# ---------------- config (mirrors parameters.BrazenParameters) --------------
WINDOW_PATCH_SHAPE = (4, 4)      # tokens per window (4x4 -> 16 tokens)
NUM_HEADS = 4
EMBEDDING_DIM = 32
HEAD_DIM = EMBEDDING_DIM // NUM_HEADS
DROPOUT_RATE = 0.0               # inference: dropout is identity
WINDOW_SHAPE = (2, 2)            # (horizontal_windows, vertical_windows)
APPLY_SHIFT = True
BATCH = 2

P_TOKENS = WINDOW_PATCH_SHAPE[0] * WINDOW_PATCH_SHAPE[1]
MASK_NEG = -1e30                 # additive mask value (avoids -inf -> NaN)


# ---------------- mask / position-bias index generation (glue, numpy) -------
def generate_mask(window_shape, patch_shape, apply_shift):
    """Port of SwinSelfAttention.generate_mask (numpy, bool)."""
    wy, wx = window_shape[1], window_shape[0]
    py, px = patch_shape[1], patch_shape[0]
    mask = np.zeros((wy, wx, py, px, py, px), dtype=bool)
    if apply_shift:
        shift_x, shift_y = patch_shape[0] // 2, patch_shape[1] // 2
        mask[-1, :, :shift_y, :, shift_y:, :] = True
        mask[-1, :, shift_y:, :, :shift_y, :] = True
        mask[:, -1, :, :shift_x, :, shift_x:] = True
        mask[:, -1, :, shift_x:, :, :shift_x] = True
    # rearrange 'wy wx by bx ty tx -> wy wx (by bx) (ty tx)'
    return mask.reshape(wy, wx, py * px, py * px)


def position_bias_indices(window_patch_shape):
    """Port of SwinSelfAttention._position_bias_indices (numpy, int)."""
    pairs = np.array([[i, j]
                      for i in range(window_patch_shape[0])
                      for j in range(window_patch_shape[1])], dtype=np.int32)
    view = pairs[:, None, :] - pairs[None, :, :] + window_patch_shape[0] - 1
    return view[:, :, 0], view[:, :, 1]


# ---------------- Pallas kernel ---------------------------------------------
def swin_attn_kernel(x_ref, bias_ref, wqkv_ref, bqkv_ref, wo_ref, bo_ref,
                     o_ref, *, embed_dim, num_heads, head_dim):
    E, H, hd = embed_dim, num_heads, head_dim

    xT = x_ref[0]                                            # (E, T)

    # Fused QKV projection, channels-first: one (3E,E)@(E,T) MXU pass.
    # 1/sqrt(hd) is already folded into the Q rows of wqkv / bqkv.
    qkvT = jnp.dot(wqkv_ref[...], xT,
                   preferred_element_type=jnp.float32) + bqkv_ref[...]  # (3E, T)

    r_heads = []
    for h in range(H):                                       # static unroll, H=4
        qh = qkvT[h * hd:(h + 1) * hd, :]                    # (hd, T) sublane view
        kh = qkvT[E + h * hd:E + (h + 1) * hd, :]            # (hd, T)
        vh = qkvT[2 * E + h * hd:2 * E + (h + 1) * hd, :]    # (hd, T)

        # Scores in key-major orientation: sT[j, i] = <k_j, q_i>.
        # One small (hd,T)->(T,hd) transpose per head; matmul is dense over T.
        sT = jnp.dot(kh.T, qh, preferred_element_type=jnp.float32)      # (T_k, T_q)
        # relative-position bias + additive (-1e30) window/batch/shift mask
        sT = sT + bias_ref[h]

        m = jnp.max(sT, axis=0, keepdims=True)               # (1, T_q)
        e = jnp.exp(sT - m)
        denom = jnp.sum(e, axis=0, keepdims=True)            # (1, T_q), >= 1
        inv = pl.reciprocal(denom, approx=True)              # EUP slot
        inv = inv * (2.0 - denom * inv)                      # one Newton step
        # TODO(synk): attention_dropout / output_dropout omitted (eval mode).

        # Un-normalized AV, then normalize the small (hd, T) result instead of
        # the (T, T) weights.
        rT = jnp.dot(vh, e, preferred_element_type=jnp.float32)          # (hd, T_q)
        r_heads.append(rT * inv)

    r_full = jnp.concatenate(r_heads, axis=0)                # (E, T), head concat
    outT = jnp.dot(wo_ref[...], r_full,
                   preferred_element_type=jnp.float32) + bo_ref[...]     # (E, T)
    o_ref[0] = outT.astype(o_ref.dtype)                      # lane-dense store


# ---------------- one-time parameter / mask preparation ---------------------
def prepare_swin_params(wq, bq, wk, bk, wv, bv, wo, bo, pos_bias,
                        window_shape, window_patch_shape, apply_shift,
                        batch, fold_batch):
    """Precompute fused/transposed weights and the dense additive bias+mask."""
    E = wq.shape[0]
    H = pos_bias.shape[0]
    hd = E // H
    inv_sqrt_d = 1.0 / math.sqrt(hd)

    # Fused, transposed QKV projection with 1/sqrt(hd) folded into Q.
    wqkvT = jnp.concatenate([(wq * inv_sqrt_d).T, wk.T, wv.T], axis=0)   # (3E, E)
    bqkvT = jnp.concatenate([bq * inv_sqrt_d, bk, bv], axis=1).T         # (3E, 1)
    woT = wo.T                                                           # (E, E)
    boT = bo.T                                                           # (E, 1)

    # Relative-position bias gathered to (H, P, P).
    idx0, idx1 = position_bias_indices(window_patch_shape)
    bias_g = np.asarray(pos_bias)[:, idx0, idx1]                         # (H, P, P)

    mask = generate_mask(window_shape, window_patch_shape, apply_shift)  # (Wy,Wx,P,P)
    Wy, Wx = mask.shape[:2]
    P = window_patch_shape[0] * window_patch_shape[1]
    NW = Wy * Wx
    NG = (batch if fold_batch else 1) * NW                               # groups/step
    T = NG * P

    # Per-window additive bias (+ shifted-window mask), then scatter onto the
    # block diagonal of a dense (T, T) grid; off-diagonal blocks (cross-window
    # and, if folded, cross-batch) get -1e30.
    add = bias_g[:, None, :, :] + np.where(mask.reshape(1, NW, P, P),
                                           MASK_NEG, 0.0)                # (H,NW,P,P)
    full = np.full((H, T, T), MASK_NEG, dtype=np.float32)
    for g in range(NG):
        w = g % NW
        full[:, g * P:(g + 1) * P, g * P:(g + 1) * P] = add[:, w]
    bias_T = jnp.asarray(np.swapaxes(full, 1, 2))            # key-major (H, T_k, T_q)

    return dict(num_heads=H, head_dim=hd, bias_T=bias_T,
                wqkvT=wqkvT, bqkvT=bqkvT, woT=woT, boT=boT)


def pick_fold_batch(batch, window_shape, window_patch_shape):
    """Fold batch into the token axis on single-TC chips (v5e/v6e); keep a
    parallel batch grid on dual-TC chips (v7x)."""
    nw = window_shape[0] * window_shape[1]
    p = window_patch_shape[0] * window_patch_shape[1]
    if batch * nw * p > 128:          # keep the dense (T,T) tile vreg-friendly
        return False
    try:
        kind = jax.devices()[0].device_kind.lower()
    except Exception:
        kind = ""
    dual_tc = "v7" in kind
    return not (dual_tc and batch > 1)


# ---------------- wrapper (per-call path: layout plumbing + pallas_call) ----
def swin_self_attention(patches, params, *, fold_batch):
    """patches: (B, Wy, Wx, P, E) float32."""
    B, Wy, Wx, P, E = patches.shape
    NW = Wy * Wx
    n_steps = 1 if fold_batch else B
    T = (B * NW * P) // n_steps

    # channels-first slab: (n_steps, E, T) -- tokens fill the lane axis.
    xT = jnp.swapaxes(patches.reshape(n_steps, T, E), 1, 2)

    kernel = functools.partial(swin_attn_kernel, embed_dim=E,
                               num_heads=params["num_heads"],
                               head_dim=params["head_dim"])

    def const_spec(arr):
        n = arr.ndim
        return pl.BlockSpec(arr.shape, lambda i, _n=n: (0,) * _n)

    outT = pl.pallas_call(
        kernel,
        out_shape=jax.ShapeDtypeStruct((n_steps, E, T), jnp.float32),
        grid_spec=pltpu.PrefetchScalarGridSpec(
            num_scalar_prefetch=0,
            grid=(n_steps,),
            in_specs=[
                pl.BlockSpec((1, E, T), lambda i: (i, 0, 0)),   # xT
                const_spec(params["bias_T"]),                   # bias + mask
                const_spec(params["wqkvT"]),                    # (3E, E)
                const_spec(params["bqkvT"]),                    # (3E, 1)
                const_spec(params["woT"]),                      # (E, E)
                const_spec(params["boT"]),                      # (E, 1)
            ],
            out_specs=pl.BlockSpec((1, E, T), lambda i: (i, 0, 0)),
        ),
        compiler_params=pltpu.CompilerParams(
            dimension_semantics=("parallel",)),
    )(xT, params["bias_T"], params["wqkvT"], params["bqkvT"],
      params["woT"], params["boT"])

    return jnp.swapaxes(outT, 1, 2).reshape(B, Wy, Wx, P, E)


# ---------------- pure-JAX reference (for correctness check) ----------------
def reference(patches, mask_bool, bias_gathered,
              wq, bq, wk, bk, wv, bv, wo, bo):
    H = bias_gathered.shape[0]
    E = patches.shape[-1]
    hd = E // H
    q = patches @ wq + bq[0]
    k = patches @ wk + bk[0]
    v = patches @ wv + bv[0]
    heads = []
    for h in range(H):
        sl = slice(h * hd, (h + 1) * hd)
        qh, kh, vh = q[..., sl], k[..., sl], v[..., sl]
        s = qh @ jnp.swapaxes(kh, -1, -2) / math.sqrt(hd)
        s = s + bias_gathered[h]
        s = jnp.where(mask_bool, -jnp.inf, s)     # broadcasts over batch
        a = jax.nn.softmax(s, axis=-1)
        heads.append(a @ vh)
    r = jnp.concatenate(heads, axis=-1)
    return r @ wo + bo[0]


# ---------------- main -------------------------------------------------------
if __name__ == "__main__":
    B, Wy, Wx = BATCH, WINDOW_SHAPE[1], WINDOW_SHAPE[0]
    P, E, H = P_TOKENS, EMBEDDING_DIM, NUM_HEADS

    key = jax.random.PRNGKey(0)
    ks = jax.random.split(key, 10)
    s = 0.05
    wq = jax.random.normal(ks[0], (E, E), jnp.float32) * s
    bq = jax.random.normal(ks[1], (1, E), jnp.float32) * s
    wk = jax.random.normal(ks[2], (E, E), jnp.float32) * s
    bk = jax.random.normal(ks[3], (1, E), jnp.float32) * s
    wv = jax.random.normal(ks[4], (E, E), jnp.float32) * s
    bv = jax.random.normal(ks[5], (1, E), jnp.float32) * s
    wo = jax.random.normal(ks[6], (E, E), jnp.float32) * s
    bo = jax.random.normal(ks[7], (1, E), jnp.float32) * s
    # module inits position_bias to zeros; use small randoms to exercise the path
    pos_bias = jax.random.normal(
        ks[8], (H, 2 * WINDOW_PATCH_SHAPE[1] - 1, 2 * WINDOW_PATCH_SHAPE[0] - 1),
        jnp.float32) * s
    patches = jax.random.normal(ks[9], (B, Wy, Wx, P, E), jnp.float32)

    # --- one-time init: fused weights + dense additive bias/mask -------------
    fold_batch = pick_fold_batch(B, WINDOW_SHAPE, WINDOW_PATCH_SHAPE)
    params = prepare_swin_params(wq, bq, wk, bk, wv, bv, wo, bo, pos_bias,
                                 WINDOW_SHAPE, WINDOW_PATCH_SHAPE, APPLY_SHIFT,
                                 batch=B, fold_batch=fold_batch)

    out = swin_self_attention(patches, params, fold_batch=fold_batch)
    out = jax.block_until_ready(out)

    # --- correctness check against the per-window reference ------------------
    idx0, idx1 = position_bias_indices(WINDOW_PATCH_SHAPE)
    bias_gathered = pos_bias[:, jnp.asarray(idx0), jnp.asarray(idx1)]
    mask_bool = jnp.asarray(
        generate_mask(WINDOW_SHAPE, WINDOW_PATCH_SHAPE, APPLY_SHIFT))
    ref = reference(patches, mask_bool, bias_gathered,
                    wq, bq, wk, bk, wv, bv, wo, bo)
    np.testing.assert_allclose(np.asarray(out), np.asarray(ref),
                               rtol=2e-4, atol=2e-4)
    print("KERNEL_OK")
</pallas_src>

<mosaic_0001>
module attributes {stable_mosaic.version = 11 : i64} {
  func.func @swin_attn_kernel(%arg0: i32, %arg1: memref<1x32x128xf32, #tpu.memory_space<vmem>>, %arg2: memref<4x128x128xf32, #tpu.memory_space<vmem>>, %arg3: memref<96x32xf32, #tpu.memory_space<vmem>>, %arg4: memref<96x1xf32, #tpu.memory_space<vmem>>, %arg5: memref<32x32xf32, #tpu.memory_space<vmem>>, %arg6: memref<32x1xf32, #tpu.memory_space<vmem>>, %arg7: memref<1x32x128xf32, #tpu.memory_space<vmem>>) attributes {dimension_semantics = [#tpu.dimension_semantics<parallel>], iteration_bounds = array<i64: 1>, scalar_prefetch = 0 : i64, scratch_operands = 0 : i64, tpu.core_type = #tpu.core_type<tc>, window_params = [{transform_indices = @transform_0, window_bounds = array<i64: 1, 32, 128>}, {pipeline_mode = #tpu.pipeline_mode<synchronous>, transform_indices = @transform_1, window_bounds = array<i64: 4, 128, 128>}, {pipeline_mode = #tpu.pipeline_mode<synchronous>, transform_indices = @transform_2, window_bounds = array<i64: 96, 32>}, {pipeline_mode = #tpu.pipeline_mode<synchronous>, transform_indices = @transform_3, window_bounds = array<i64: 96, 1>}, {pipeline_mode = #tpu.pipeline_mode<synchronous>, transform_indices = @transform_4, window_bounds = array<i64: 32, 32>}, {pipeline_mode = #tpu.pipeline_mode<synchronous>, transform_indices = @transform_5, window_bounds = array<i64: 32, 1>}, {transform_indices = @transform_6, window_bounds = array<i64: 1, 32, 128>}]} {
    %c0 = arith.constant 0 : index
    %c0_0 = arith.constant 0 : index
    %c0_1 = arith.constant 0 : index
    %0 = vector.load %arg1[%c0, %c0_0, %c0_1] : memref<1x32x128xf32, #tpu.memory_space<vmem>>, vector<1x32x128xf32>
    %1 = vector.shape_cast %0 : vector<1x32x128xf32> to vector<32x128xf32>
    %c0_2 = arith.constant 0 : index
    %c0_3 = arith.constant 0 : index
    %2 = vector.load %arg3[%c0_2, %c0_3] : memref<96x32xf32, #tpu.memory_space<vmem>>, vector<96x32xf32>
    %cst = arith.constant dense<0.000000e+00> : vector<96x128xf32>
    %3 = tpu.matmul %2, %1, %cst {dimension_numbers = #tpu.dot_dimension_numbers<[1], [0], [0], [1], [0, 0, 1, 1], [], []>} : vector<96x32xf32>, vector<32x128xf32>, vector<96x128xf32> -> vector<96x128xf32>
    %c0_4 = arith.constant 0 : index
    %c0_5 = arith.constant 0 : index
    %4 = vector.load %arg4[%c0_4, %c0_5] : memref<96x1xf32, #tpu.memory_space<vmem>>, vector<96x1xf32>
    %5 = vector.broadcast %4 : vector<96x1xf32> to vector<96x128xf32>
    %6 = arith.addf %3, %5 : vector<96x128xf32>
    %7 = vector.extract_strided_slice %6 {offsets = [0, 0], sizes = [8, 128], strides = [1, 1]} : vector<96x128xf32> to vector<8x128xf32>
    %8 = vector.extract_strided_slice %6 {offsets = [32, 0], sizes = [8, 128], strides = [1, 1]} : vector<96x128xf32> to vector<8x128xf32>
    %9 = vector.extract_strided_slice %6 {offsets = [64, 0], sizes = [8, 128], strides = [1, 1]} : vector<96x128xf32> to vector<8x128xf32>
    %10 = tpu.transpose %8, [1, 0] : vector<8x128xf32> -> vector<128x8xf32>
    %cst_6 = arith.constant dense<0.000000e+00> : vector<128x128xf32>
    %11 = tpu.matmul %10, %7, %cst_6 {dimension_numbers = #tpu.dot_dimension_numbers<[1], [0], [0], [1], [0, 0, 1, 1], [], []>} : vector<128x8xf32>, vector<8x128xf32>, vector<128x128xf32> -> vector<128x128xf32>
    %c0_7 = arith.constant 0 : index
    %c0_8 = arith.constant 0 : index
    %c0_9 = arith.constant 0 : index
    %12 = vector.load %arg2[%c0_7, %c0_8, %c0_9] : memref<4x128x128xf32, #tpu.memory_space<vmem>>, vector<1x128x128xf32>
    %13 = vector.shape_cast %12 : vector<1x128x128xf32> to vector<128x128xf32>
    %14 = arith.addf %11, %13 : vector<128x128xf32>
    %cst_10 = arith.constant dense<0xFF800000> : vector<128xf32>
    %15 = vector.multi_reduction <maximumf>, %14, %cst_10 [0] : vector<128x128xf32> to vector<128xf32>
    %16 = vector.shape_cast %15 : vector<128xf32> to vector<1x128xf32>
    %17 = vector.broadcast %16 : vector<1x128xf32> to vector<128x128xf32>
    %18 = arith.subf %14, %17 : vector<128x128xf32>
    %19 = math.exp %18 : vector<128x128xf32>
    %cst_11 = arith.constant dense<0.000000e+00> : vector<128xf32>
    %20 = vector.multi_reduction <add>, %19, %cst_11 [0] : vector<128x128xf32> to vector<128xf32>
    %21 = vector.shape_cast %20 : vector<128xf32> to vector<1x128xf32>
    %22 = tpu.reciprocal %21 {approx = true} : vector<1x128xf32> -> vector<1x128xf32>
    %23 = arith.mulf %21, %22 : vector<1x128xf32>
    %cst_12 = arith.constant 2.000000e+00 : f32
    %24 = vector.broadcast %cst_12 : f32 to vector<1x128xf32>
    %25 = arith.subf %24, %23 : vector<1x128xf32>
    %26 = arith.mulf %22, %25 : vector<1x128xf32>
    %cst_13 = arith.constant dense<0.000000e+00> : vector<8x128xf32>
    %27 = tpu.matmul %9, %19, %cst_13 {dimension_numbers = #tpu.dot_dimension_numbers<[1], [0], [0], [1], [0, 0, 1, 1], [], []>} : vector<8x128xf32>, vector<128x128xf32>, vector<8x128xf32> -> vector<8x128xf32>
    %28 = vector.broadcast %26 : vector<1x128xf32> to vector<8x128xf32>
    %29 = arith.mulf %27, %28 : vector<8x128xf32>
    %30 = vector.extract_strided_slice %6 {offsets = [8, 0], sizes = [8, 128], strides = [1, 1]} : vector<96x128xf32> to vector<8x128xf32>
    %31 = vector.extract_strided_slice %6 {offsets = [40, 0], sizes = [8, 128], strides = [1, 1]} : vector<96x128xf32> to vector<8x128xf32>
    %32 = vector.extract_strided_slice %6 {offsets = [72, 0], sizes = [8, 128], strides = [1, 1]} : vector<96x128xf32> to vector<8x128xf32>
    %33 = tpu.transpose %31, [1, 0] : vector<8x128xf32> -> vector<128x8xf32>
    %cst_14 = arith.constant dense<0.000000e+00> : vector<128x128xf32>
    %34 = tpu.matmul %33, %30, %cst_14 {dimension_numbers = #tpu.dot_dimension_numbers<[1], [0], [0], [1], [0, 0, 1, 1], [], []>} : vector<128x8xf32>, vector<8x128xf32>, vector<128x128xf32> -> vector<128x128xf32>
    %c1 = arith.constant 1 : index
    %c0_15 = arith.constant 0 : index
    %c0_16 = arith.constant 0 : index
    %35 = vector.load %arg2[%c1, %c0_15, %c0_16] : memref<4x128x128xf32, #tpu.memory_space<vmem>>, vector<1x128x128xf32>
    %36 = vector.shape_cast %35 : vector<1x128x128xf32> to vector<128x128xf32>
    %37 = arith.addf %34, %36 : vector<128x128xf32>
    %cst_17 = arith.constant dense<0xFF800000> : vector<128xf32>
    %38 = vector.multi_reduction <maximumf>, %37, %cst_17 [0] : vector<128x128xf32> to vector<128xf32>
    %39 = vector.shape_cast %38 : vector<128xf32> to vector<1x128xf32>
    %40 = vector.broadcast %39 : vector<1x128xf32> to vector<128x128xf32>
    %41 = arith.subf %37, %40 : vector<128x128xf32>
    %42 = math.exp %41 : vector<128x128xf32>
    %cst_18 = arith.constant dense<0.000000e+00> : vector<128xf32>
    %43 = vector.multi_reduction <add>, %42, %cst_18 [0] : vector<128x128xf32> to vector<128xf32>
    %44 = vector.shape_cast %43 : vector<128xf32> to vector<1x128xf32>
    %45 = tpu.reciprocal %44 {approx = true} : vector<1x128xf32> -> vector<1x128xf32>
    %46 = arith.mulf %44, %45 : vector<1x128xf32>
    %cst_19 = arith.constant 2.000000e+00 : f32
    %47 = vector.broadcast %cst_19 : f32 to vector<1x128xf32>
    %48 = arith.subf %47, %46 : vector<1x128xf32>
    %49 = arith.mulf %45, %48 : vector<1x128xf32>
    %cst_20 = arith.constant dense<0.000000e+00> : vector<8x128xf32>
    %50 = tpu.matmul %32, %42, %cst_20 {dimension_numbers = #tpu.dot_dimension_numbers<[1], [0], [0], [1], [0, 0, 1, 1], [], []>} : vector<8x128xf32>, vector<128x128xf32>, vector<8x128xf32> -> vector<8x128xf32>
    %51 = vector.broadcast %49 : vector<1x128xf32> to vector<8x128xf32>
    %52 = arith.mulf %50, %51 : vector<8x128xf32>
    %53 = vector.extract_strided_slice %6 {offsets = [16, 0], sizes = [8, 128], strides = [1, 1]} : vector<96x128xf32> to vector<8x128xf32>
    %54 = vector.extract_strided_slice %6 {offsets = [48, 0], sizes = [8, 128], strides = [1, 1]} : vector<96x128xf32> to vector<8x128xf32>
    %55 = vector.extract_strided_slice %6 {offsets = [80, 0], sizes = [8, 128], strides = [1, 1]} : vector<96x128xf32> to vector<8x128xf32>
    %56 = tpu.transpose %54, [1, 0] : vector<8x128xf32> -> vector<128x8xf32>
    %cst_21 = arith.constant dense<0.000000e+00> : vector<128x128xf32>
    %57 = tpu.matmul %56, %53, %cst_21 {dimension_numbers = #tpu.dot_dimension_numbers<[1], [0], [0], [1], [0, 0, 1, 1], [], []>} : vector<128x8xf32>, vector<8x128xf32>, vector<128x128xf32> -> vector<128x128xf32>
    %c2 = arith.constant 2 : index
    %c0_22 = arith.constant 0 : index
    %c0_23 = arith.constant 0 : index
    %58 = vector.load %arg2[%c2, %c0_22, %c0_23] : memref<4x128x128xf32, #tpu.memory_space<vmem>>, vector<1x128x128xf32>
    %59 = vector.shape_cast %58 : vector<1x128x128xf32> to vector<128x128xf32>
    %60 = arith.addf %57, %59 : vector<128x128xf32>
    %cst_24 = arith.constant dense<0xFF800000> : vector<128xf32>
    %61 = vector.multi_reduction <maximumf>, %60, %cst_24 [0] : vector<128x128xf32> to vector<128xf32>
    %62 = vector.shape_cast %61 : vector<128xf32> to vector<1x128xf32>
    %63 = vector.broadcast %62 : vector<1x128xf32> to vector<128x128xf32>
    %64 = arith.subf %60, %63 : vector<128x128xf32>
    %65 = math.exp %64 : vector<128x128xf32>
    %cst_25 = arith.constant dense<0.000000e+00> : vector<128xf32>
    %66 = vector.multi_reduction <add>, %65, %cst_25 [0] : vector<128x128xf32> to vector<128xf32>
    %67 = vector.shape_cast %66 : vector<128xf32> to vector<1x128xf32>
    %68 = tpu.reciprocal %67 {approx = true} : vector<1x128xf32> -> vector<1x128xf32>
    %69 = arith.mulf %67, %68 : vector<1x128xf32>
    %cst_26 = arith.constant 2.000000e+00 : f32
    %70 = vector.broadcast %cst_26 : f32 to vector<1x128xf32>
    %71 = arith.subf %70, %69 : vector<1x128xf32>
    %72 = arith.mulf %68, %71 : vector<1x128xf32>
    %cst_27 = arith.constant dense<0.000000e+00> : vector<8x128xf32>
    %73 = tpu.matmul %55, %65, %cst_27 {dimension_numbers = #tpu.dot_dimension_numbers<[1], [0], [0], [1], [0, 0, 1, 1], [], []>} : vector<8x128xf32>, vector<128x128xf32>, vector<8x128xf32> -> vector<8x128xf32>
    %74 = vector.broadcast %72 : vector<1x128xf32> to vector<8x128xf32>
    %75 = arith.mulf %73, %74 : vector<8x128xf32>
    %76 = vector.extract_strided_slice %6 {offsets = [24, 0], sizes = [8, 128], strides = [1, 1]} : vector<96x128xf32> to vector<8x128xf32>
    %77 = vector.extract_strided_slice %6 {offsets = [56, 0], sizes = [8, 128], strides = [1, 1]} : vector<96x128xf32> to vector<8x128xf32>
    %78 = vector.extract_strided_slice %6 {offsets = [88, 0], sizes = [8, 128], strides = [1, 1]} : vector<96x128xf32> to vector<8x128xf32>
    %79 = tpu.transpose %77, [1, 0] : vector<8x128xf32> -> vector<128x8xf32>
    %cst_28 = arith.constant dense<0.000000e+00> : vector<128x128xf32>
    %80 = tpu.matmul %79, %76, %cst_28 {dimension_numbers = #tpu.dot_dimension_numbers<[1], [0], [0], [1], [0, 0, 1, 1], [], []>} : vector<128x8xf32>, vector<8x128xf32>, vector<128x128xf32> -> vector<128x128xf32>
    %c3 = arith.constant 3 : index
    %c0_29 = arith.constant 0 : index
    %c0_30 = arith.constant 0 : index
    %81 = vector.load %arg2[%c3, %c0_29, %c0_30] : memref<4x128x128xf32, #tpu.memory_space<vmem>>, vector<1x128x128xf32>
    %82 = vector.shape_cast %81 : vector<1x128x128xf32> to vector<128x128xf32>
    %83 = arith.addf %80, %82 : vector<128x128xf32>
    %cst_31 = arith.constant dense<0xFF800000> : vector<128xf32>
    %84 = vector.multi_reduction <maximumf>, %83, %cst_31 [0] : vector<128x128xf32> to vector<128xf32>
    %85 = vector.shape_cast %84 : vector<128xf32> to vector<1x128xf32>
    %86 = vector.broadcast %85 : vector<1x128xf32> to vector<128x128xf32>
    %87 = arith.subf %83, %86 : vector<128x128xf32>
    %88 = math.exp %87 : vector<128x128xf32>
    %cst_32 = arith.constant dense<0.000000e+00> : vector<128xf32>
    %89 = vector.multi_reduction <add>, %88, %cst_32 [0] : vector<128x128xf32> to vector<128xf32>
    %90 = vector.shape_cast %89 : vector<128xf32> to vector<1x128xf32>
    %91 = tpu.reciprocal %90 {approx = true} : vector<1x128xf32> -> vector<1x128xf32>
    %92 = arith.mulf %90, %91 : vector<1x128xf32>
    %cst_33 = arith.constant 2.000000e+00 : f32
    %93 = vector.broadcast %cst_33 : f32 to vector<1x128xf32>
    %94 = arith.subf %93, %92 : vector<1x128xf32>
    %95 = arith.mulf %91, %94 : vector<1x128xf32>
    %cst_34 = arith.constant dense<0.000000e+00> : vector<8x128xf32>
    %96 = tpu.matmul %78, %88, %cst_34 {dimension_numbers = #tpu.dot_dimension_numbers<[1], [0], [0], [1], [0, 0, 1, 1], [], []>} : vector<8x128xf32>, vector<128x128xf32>, vector<8x128xf32> -> vector<8x128xf32>
    %97 = vector.broadcast %95 : vector<1x128xf32> to vector<8x128xf32>
    %98 = arith.mulf %96, %97 : vector<8x128xf32>
    %99 = tpu.concatenate %29, %52, %75, %98 in 0 : vector<8x128xf32>, vector<8x128xf32>, vector<8x128xf32>, vector<8x128xf32> -> vector<32x128xf32>
    %c0_35 = arith.constant 0 : index
    %c0_36 = arith.constant 0 : index
    %100 = vector.load %arg5[%c0_35, %c0_36] : memref<32x32xf32, #tpu.memory_space<vmem>>, vector<32x32xf32>
    %cst_37 = arith.constant dense<0.000000e+00> : vector<32x128xf32>
    %101 = tpu.matmul %100, %99, %cst_37 {dimension_numbers = #tpu.dot_dimension_numbers<[1], [0], [0], [1], [0, 0, 1, 1], [], []>} : vector<32x32xf32>, vector<32x128xf32>, vector<32x128xf32> -> vector<32x128xf32>
    %c0_38 = arith.constant 0 : index
    %c0_39 = arith.constant 0 : index
    %102 = vector.load %arg6[%c0_38, %c0_39] : memref<32x1xf32, #tpu.memory_space<vmem>>, vector<32x1xf32>
    %103 = vector.broadcast %102 : vector<32x1xf32> to vector<32x128xf32>
    %104 = arith.addf %101, %103 : vector<32x128xf32>
    %c0_40 = arith.constant 0 : index
    %c0_41 = arith.constant 0 : index
    %c0_42 = arith.constant 0 : index
    %105 = vector.load %arg7[%c0_40, %c0_41, %c0_42] : memref<1x32x128xf32, #tpu.memory_space<vmem>>, vector<1x32x128xf32>
    %106 = vector.shape_cast %105 : vector<1x32x128xf32> to vector<32x128xf32>
    %107 = vector.shape_cast %104 : vector<32x128xf32> to vector<1x32x128xf32>
    tpu.vector_store %arg7[%c0_40, %c0_41, %c0_42], %107 {strides = array<i32>} : memref<1x32x128xf32, #tpu.memory_space<vmem>>, vector<1x32x128xf32>,
    return
  }
  func.func @transform_0(%arg0: i32) -> (i32, i32, i32) {
    %c0_i32 = arith.constant 0 : i32
    %c0_i32_0 = arith.constant 0 : i32
    %c0_i32_1 = arith.constant 0 : i32
    return %arg0, %c0_i32, %c0_i32_0 : i32, i32, i32
  }
  func.func @transform_1(%arg0: i32) -> (i32, i32, i32) {
    %c0_i32 = arith.constant 0 : i32
    %c0_i32_0 = arith.constant 0 : i32
    %c0_i32_1 = arith.constant 0 : i32
    %c0_i32_2 = arith.constant 0 : i32
    return %c0_i32, %c0_i32_0, %c0_i32_1 : i32, i32, i32
  }
  func.func @transform_2(%arg0: i32) -> (i32, i32) {
    %c0_i32 = arith.constant 0 : i32
    %c0_i32_0 = arith.constant 0 : i32
    %c0_i32_1 = arith.constant 0 : i32
    return %c0_i32, %c0_i32_0 : i32, i32
  }
  func.func @transform_3(%arg0: i32) -> (i32, i32) {
    %c0_i32 = arith.constant 0 : i32
    %c0_i32_0 = arith.constant 0 : i32
    %c0_i32_1 = arith.constant 0 : i32
    return %c0_i32, %c0_i32_0 : i32, i32
  }
  func.func @transform_4(%arg0: i32) -> (i32, i32) {
    %c0_i32 = arith.constant 0 : i32
    %c0_i32_0 = arith.constant 0 : i32
    %c0_i32_1 = arith.constant 0 : i32
    return %c0_i32, %c0_i32_0 : i32, i32
  }
  func.func @transform_5(%arg0: i32) -> (i32, i32) {
    %c0_i32 = arith.constant 0 : i32
    %c0_i32_0 = arith.constant 0 : i32
    %c0_i32_1 = arith.constant 0 : i32
    return %c0_i32, %c0_i32_0 : i32, i32
  }
  func.func @transform_6(%arg0: i32) -> (i32, i32, i32) {
    %c0_i32 = arith.constant 0 : i32
    %c0_i32_0 = arith.constant 0 : i32
    %c0_i32_1 = arith.constant 0 : i32
    return %arg0, %c0_i32, %c0_i32_0 : i32, i32, i32
  }
}

</mosaic_0001>

<bundles_post_ra>
// kernel: tpu_custom_call.1
= control target key start
LH: loop header
LB: loop body
LE: loop exit
PB: predicated region body
PF: predicated region fallthrough
CT: control target
= control target key end

     0   :  { %11 = vsyncpa [#allocation3], 0  ;;  %s3653_s0 = inlined_call_operand.vmem [shape: f32[1,32,128], index: 0, kind: input, shape index: {}]   ;;  %s3654_s1 = inlined_call_operand.hbm [shape: f32[4,128,128], index: 1, kind: input, shape index: {}]   ;;  %s3655_s2 = inlined_call_operand.vmem [shape: f32[96,32], index: 2, kind: input, shape index: {}]   ;;  %s3656_s3 = inlined_call_operand.vmem [shape: f32[96,1], index: 3, kind: input, shape index: {}]   ;;  %s3657_s4 = inlined_call_operand.vmem [shape: f32[32,32], index: 4, kind: input, shape index: {}]   ;;  %s3658_s5 = inlined_call_operand.vmem [shape: f32[32,1], index: 5, kind: input, shape index: {}]   ;;  %s3659_s6 = inlined_call_operand.hbm [shape: f32[1,32,128], index: 6, kind: output, shape index: {}]  }
   0x1   :  { %12 = vsyncpa [#allocation4], 0  ;;  %s2783_s21 = smov [#allocation2]  }
   0x2   :  { %s20_s22 = sshll.u32 %s2783_s21, 4  ;;  %s21_s22 = int_to_ptr.vmem [resolvable:$true] %s20_s22 }
   0x3   :  { %s2747_s23 = scalar_lea.vmem %s21_s22, 8192  ;;  %p2752_p1 = scmp.lt.s32.totalorder %s21_s22, %s21_s22 }
   0x4   :  { %p2748_p0 = scmp.ne.s32.totalorder %s21_s22, %s2747_s23  ;;  %p2753_p2 = scmp.lt.s32.totalorder %s2747_s23, %s2747_s23 }
   0x6   :  { %p2754_p3 = por %p2753_p2, %p2752_p1 }
   0x8   :  { %p2755_p4 = pnand %p2754_p3, %p2748_p0 }
   0xa   :  { %2758 = shalt.err (!%p2755_p4)
}
   0xb   :  { %s2784_s24 = smov 128   ;;  %s2785_s25 = smov 8  }
   0xc   :  { %26 = dma.hbm_to_vmem [thread:$0]  %s3654_s1, 8192, %s21_s22, [#allocation3], %s2784_s24, %s2784_s24, %s2785_s25  }
   0xd   :  { %2779 = dma.done.wait [#allocation3], 8192  }
   0xe   :  { %2780 = vsyncadd [#allocation3], 4294959104  ;;  %v2786_v0 = vmov 0   ;;  %vm126_vm0 = vcmask 261120   ;;  %v41_v1 = vld [vmem:[%s3653_s0 + $0x18] sm:$0xff]  ;;  %v40_v2 = vld [vmem:[%s3653_s0 + $0x10] sm:$0xff] }
   0xf   :  { %2602 = vset.pattern.permute.xlu1 %v2786_v0  ;;  %2601 = vset.pattern.permute.xlu0 %v2786_v0  ;;  %v42_v3 = vld [vmem:[%s3655_s2] sm:$0xff]  ;;  %v39_v4 = vld [vmem:[%s3653_s0 + $0x8] sm:$0xff]  ;;  %v44_v11 = vld [vmem:[%s3655_s2 + $0x10] sm:$0xff]  ;;  %vm336_vm1 = vcmask 64512   ;;  %vm2788_vm2 = vmmov 0   ;;  %s2789_s23 = smov [#allocation5]  }
  0x10   :  { %2302 = vmatprep.subr.mxu0 %v41_v1  ;;  %2586 = vmatprep.subr.mxu1 %v41_v1  ;;  %v55_v5 = vld [vmem:[%s3656_s3 + $0x8] sm:$0xff]  ;;  %v38_v7 = vld [vmem:[%s3653_s0] sm:$0xff]  ;;  %v45_v12 = vld [vmem:[%s3655_s2 + $0x18] sm:$0xff]  ;;  %s2050_s0 = sshll.u32 %s2789_s23, 4  ;;  %s2051_s0 = int_to_ptr.vmem [resolvable:$true] %s2050_s0 }
  0x11   :  { %2303 = vmatpush3.msra.mxu0 %v41_v1  ;;  %2310 = vmatprep.mubr.msk.f32.mxu0 %vm126_vm0, %v42_v3  ;;  %v59_v6 = vld [vmem:[%s3656_s3 + $0x28] sm:$0xff]  ;;  %v54_v8 = vld [vmem:[%s3656_s3] sm:$0xff]  ;;  %v52_v15 = vld [vmem:[%s3655_s2 + $0x50] sm:$0xff]  ;;  %p2764_p6 = scmp.lt.s32.totalorder %s2051_s0, %s2051_s0 }
  0x12   :  { %2304 = vmatprep.subr.mxu0 %v40_v2  ;;  %2590 = vmatpush3.msra.mxu1 %v41_v1  ;;  %v43_v9 = vld [vmem:[%s3655_s2 + $0x8] sm:$0xff]  ;;  %v58_v10 = vld [vmem:[%s3656_s3 + $0x20] sm:$0xff]  ;;  %v53_v16 = vld [vmem:[%s3655_s2 + $0x58] sm:$0xff] }
  0x13   :  { %2305 = vmatpush3.msra.mxu0 %v40_v2  ;;  %73 = vperm.xlu1 %2602, %v55_v5   ;;  %v46_v13 = vld [vmem:[%s3655_s2 + $0x20] sm:$0xff]  ;;  %v47_v14 = vld [vmem:[%s3655_s2 + $0x28] sm:$0xff]  ;;  %v48_v17 = vld [vmem:[%s3655_s2 + $0x30] sm:$0xff] }
  0x14   :  { %2306 = vmatprep.subr.mxu0 %v39_v4  ;;  %93 = vperm.xlu0 %2601, %v59_v6   ;;  %v49_v18 = vld [vmem:[%s3655_s2 + $0x38] sm:$0xff]  ;;  %v50_v19 = vld [vmem:[%s3655_s2 + $0x40] sm:$0xff]  ;;  %v51_v20 = vld [vmem:[%s3655_s2 + $0x48] sm:$0xff] }
  0x15   :  { %2307 = vmatpush3.msra.mxu0 %v39_v4  ;;  %2587 = vmatprep.subr.mxu1 %v40_v2  ;;  %v60_v35 = vld [vmem:[%s3656_s3 + $0x30] sm:$0xff]  ;;  %v57_v36 = vld [vmem:[%s3656_s3 + $0x18] sm:$0xff]  ;;  %v63_v39 = vld [vmem:[%s3656_s3 + $0x48] sm:$0xff] }
  0x16   :  { %2308 = vmatprep.subr.mxu0 %v38_v7  ;;  %2591 = vmatpush3.msra.mxu1 %v40_v2  ;;  %v56_v37 = vld [vmem:[%s3656_s3 + $0x10] sm:$0xff]  ;;  %v61_v38 = vld [vmem:[%s3656_s3 + $0x38] sm:$0xff]  ;;  %v62_v40 = vld [vmem:[%s3656_s3 + $0x40] sm:$0xff] }
  0x17   :  { %2309 = vmatpush3.msra.mxu0 %v38_v7  ;;  %68 = vperm.xlu1 %2602, %v54_v8  }
  0x18   :  { %2311 = vmatmul.mubr.msk.f32.vlgmr.msra.gmra.mxu0 %vm126_vm0, %v43_v9  ;;  %88 = vperm.xlu0 %2601, %v58_v10  }
  0x19   :  { %2313 = vmatprep.mubr.msk.f32.mxu0 %vm126_vm0, %v44_v11  ;;  %2588 = vmatprep.subr.mxu1 %v39_v4 }
  0x1a   :  { %2592 = vmatpush3.msra.mxu1 %v39_v4  ;;  %2325 = vmatprep.mubr.msk.f32.mxu1 %vm126_vm0, %v52_v15  ;;  %v3660_v15 = vmov 0.0  }
  0x1b   :  { %2589 = vmatprep.subr.mxu1 %v38_v7 }
  0x1c   :  { %2314 = vmatmul.mubr.msk.f32.gmra.mxu0 %vm126_vm0, %v45_v12  ;;  %2593 = vmatpush3.msra.mxu1 %v38_v7 }
  0x1d   :  { %2316 = vmatprep.mubr.msk.f32.mxu0 %vm126_vm0, %v46_v13  ;;  %2326 = vmatmul.mubr.msk.f32.vlgmr.msra.gmra.mxu1 %vm126_vm0, %v53_v16  ;;  %v64_v16 = vld [vmem:[%s3656_s3 + $0x50] sm:$0xff] }
  0x20   :  { %2317 = vmatmul.mubr.msk.f32.gmra.mxu0 %vm126_vm0, %v47_v14 }
  0x21   :  { %2319 = vmatprep.mubr.msk.f32.mxu0 %vm126_vm0, %v48_v17  ;;  %v1921_v17 = vld [vmem:[%s3658_s5 + $0x8] sm:$0xff] }
  0x24   :  { %2320 = vmatmul.mubr.msk.f32.gmra.mxu0 %vm126_vm0, %v49_v18  ;;  %v1923_v18 = vld [vmem:[%s3658_s5 + $0x18] sm:$0xff] }
  0x25   :  { %2322 = vmatprep.mubr.msk.f32.mxu0 %vm126_vm0, %v50_v19  ;;  %v65_v19 = vld [vmem:[%s3656_s3 + $0x58] sm:$0xff] }
  0x28   :  { %2323 = vmatmul.mubr.msk.f32.gmra.mxu0 %vm126_vm0, %v51_v20 }
  0x8e   :  { %v74_v21 = vpop.permute.xlu1 %73 }
  0x8f   :  { %v94_v27 = vpop.permute.xlu0 %93 }
  0x92   :  { %v69_v23 = vpop.permute.xlu1 %68 }
  0x93   :  { %v89_v32 = vpop.permute.xlu0 %88 }
  0xd8   :  { %v2312_v22 = vpop.f32.mrf.mxu0 }
  0xd9   :  { %v235_v24 = vadd.f32 %v2312_v22, %v74_v21  ;;  %v1920_v22 = vld [vmem:[%s3658_s5] sm:$0xff] }
  0xda   :  { %v229_v25 = vpop.f32.mrf.mxu0 }
  0xdb   :  { %v230_v26 = vadd.f32 %v229_v25, %v69_v23  ;;  %2389 = vmatprep.subr.mxu0 %v235_v24 }
  0xdc   :  { %v2903_v28 = vpop.f32.mrf.mxu0  ;;  %2390 = vmatpush3.msra.mxu0 %v235_v24 }
  0xdd   :  { %2328 = vmatprep.subr.mxu1 %v230_v26  ;;  %2415 = vmatprep.subr.mxu0 %v3660_v15  ;;  %v2975_v20 = vpop.f32.mrf.mxu1 }
  0xde   :  { %v2905_v29 = vpop.f32.mrf.mxu0  ;;  %2329 = vmatpush3.msra.mxu1 %v230_v26  ;;  %3665 = vst [vmem:[#allocation8_spill] sm:$0xff] %v2975_v20  ;;  %v1922_v26 = vld [vmem:[%s3658_s5 + $0x10] sm:$0xff] }
  0xdf   :  { %2354 = vmatprep.subr.mxu1 %v3660_v15  ;;  %v2984_v24 = vpop.f32.mrf.mxu1 }
  0xe0   :  { %v2318_v30 = vpop.f32.mrf.mxu0  ;;  %3666 = vst [vmem:[#allocation9_spill] sm:$0xff] %v2984_v24 }
  0xe1   :  { %v255_v31 = vadd.f32 %v2318_v30, %v94_v27 }
  0xe2   :  { %v249_v33 = vpop.f32.mrf.mxu0 }
  0xe3   :  { %v250_v34 = vadd.f32 %v249_v33, %v89_v32  ;;  %695 = vxpose.xlu0.b32.start.end [1/1] (short) %v255_v31, 128 }
  0xe4   :  { %v2321_v9 = vpop.f32.mrf.mxu0 }
  0xe5   :  { %288 = vxpose.xlu1.b32.start.end [1/1] (short) %v250_v34, 128 }
  0xe6   :  { %v259_v10 = vpop.f32.mrf.mxu0 }
  0xe8   :  { %v2977_v21 = vpop.f32.mrf.mxu0 }
  0xea   :  { %v2982_v23 = vpop.f32.mrf.mxu0 }
 0x13f   :  { %98 = vperm.xlu1 %2602, %v60_v35  }
 0x143   :  { %83 = vperm.xlu1 %2602, %v57_v36  }
 0x147   :  { %78 = vperm.xlu1 %2602, %v56_v37  }
 0x148   :  { %103 = vperm.xlu0 %2601, %v61_v38  }
 0x14c   :  { %113 = vperm.xlu0 %2601, %v63_v39  }
 0x150   :  { %108 = vperm.xlu0 %2601, %v62_v40  }
 0x15f   :  { %v711_v41 = vpop.trf.xlu0 }
 0x160   :  { %2391 = vmatprep.mubr.msk.f32.mxu0 %vm336_vm1, %v711_v41 }
 0x161   :  { %v304_v42 = vpop.trf.xlu1 }
 0x162   :  { %2330 = vmatprep.mubr.msk.f32.mxu1 %vm336_vm1, %v304_v42 }
 0x163   :  { %v712_v43 = vpop.trf.xlu0 }
 0x164   :  { %2392 = vmatmul.mubr.msk.f32.vlgmr.msra.gmra.mxu0 %vm336_vm1, %v712_v43 }
 0x165   :  { %v305_v44 = vpop.trf.xlu1 }
 0x166   :  { %2331 = vmatmul.mubr.msk.f32.vlgmr.msra.gmra.mxu1 %vm336_vm1, %v305_v44 }
 0x167   :  { %v713_v45 = vpop.trf.xlu0 }
 0x168   :  { %2394 = vmatprep.mubr.msk.f32.mxu0 %vm336_vm1, %v713_v45 }
 0x169   :  { %v306_v46 = vpop.trf.xlu1 }
 0x16a   :  { %2333 = vmatprep.mubr.msk.f32.mxu1 %vm336_vm1, %v306_v46 }
 0x16b   :  { %v714_v47 = vpop.trf.xlu0 }
 0x16c   :  { %2395 = vmatmul.mubr.msk.f32.gmra.mxu0 %vm336_vm1, %v714_v47 }
 0x16d   :  { %v307_v48 = vpop.trf.xlu1 }
 0x16e   :  { %2334 = vmatmul.mubr.msk.f32.gmra.mxu1 %vm336_vm1, %v307_v48 }
 0x16f   :  { %v715_v49 = vpop.trf.xlu0 }
 0x170   :  { %2397 = vmatprep.mubr.msk.f32.mxu0 %vm336_vm1, %v715_v49  ;;  %v729_v49 = vld [vmem:[#allocation2 + $0x88] sm:$0xff] }
 0x171   :  { %v308_v50 = vpop.trf.xlu1 }
 0x172   :  { %2336 = vmatprep.mubr.msk.f32.mxu1 %vm336_vm1, %v308_v50 }
 0x173   :  { %v716_v51 = vpop.trf.xlu0 }
 0x174   :  { %2398 = vmatmul.mubr.msk.f32.gmra.mxu0 %vm336_vm1, %v716_v51  ;;  %v321_v51 = vld [vmem:[#allocation2 + $0x8] sm:$0xff] }
 0x175   :  { %v309_v52 = vpop.trf.xlu1 }
 0x176   :  { %2337 = vmatmul.mubr.msk.f32.gmra.mxu1 %vm336_vm1, %v309_v52  ;;  %v733_v52 = vld [vmem:[#allocation2 + $0xa8] sm:$0xff] }
 0x177   :  { %v717_v53 = vpop.trf.xlu0 }
 0x178   :  { %2400 = vmatprep.mubr.msk.f32.mxu0 %vm336_vm1, %v717_v53  ;;  %v325_v53 = vld [vmem:[#allocation2 + $0x28] sm:$0xff] }
 0x179   :  { %v310_v54 = vpop.trf.xlu1 }
 0x17a   :  { %2339 = vmatprep.mubr.msk.f32.mxu1 %vm336_vm1, %v310_v54  ;;  %v728_v54 = vld [vmem:[#allocation2 + $0x80] sm:$0xff] }
 0x17b   :  { %v718_v55 = vpop.trf.xlu0 }
 0x17c   :  { %2401 = vmatmul.mubr.msk.f32.gmra.mxu0 %vm336_vm1, %v718_v55  ;;  %v732_v55 = vld [vmem:[#allocation2 + $0xa0] sm:$0xff] }
 0x17d   :  { %v311_v56 = vpop.trf.xlu1 }
 0x17e   :  { %2340 = vmatmul.mubr.msk.f32.gmra.mxu1 %vm336_vm1, %v311_v56  ;;  %v324_v56 = vld [vmem:[#allocation2 + $0x20] sm:$0xff] }
 0x17f   :  { %v719_v57 = vpop.trf.xlu0 }
 0x180   :  { %2403 = vmatprep.mubr.msk.f32.mxu0 %vm336_vm1, %v719_v57 }
 0x181   :  { %v312_v58 = vpop.trf.xlu1 }
 0x182   :  { %2342 = vmatprep.mubr.msk.f32.mxu1 %vm336_vm1, %v312_v58  ;;  %v320_v58 = vld [vmem:[#allocation2] sm:$0xff] }
 0x183   :  { %v720_v59 = vpop.trf.xlu0 }
 0x184   :  { %2404 = vmatmul.mubr.msk.f32.gmra.mxu0 %vm336_vm1, %v720_v59  ;;  %v731_v59 = vld [vmem:[#allocation2 + $0x98] sm:$0xff] }
 0x185   :  { %v313_v60 = vpop.trf.xlu1 }
 0x186   :  { %2343 = vmatmul.mubr.msk.f32.gmra.mxu1 %vm336_vm1, %v313_v60  ;;  %v735_v60 = vld [vmem:[#allocation2 + $0xb8] sm:$0xff] }
 0x187   :  { %v721_v61 = vpop.trf.xlu0 }
 0x188   :  { %2406 = vmatprep.mubr.msk.f32.mxu0 %vm336_vm1, %v721_v61  ;;  %v323_v61 = vld [vmem:[#allocation2 + $0x18] sm:$0xff] }
 0x189   :  { %v314_v62 = vpop.trf.xlu1 }
 0x18a   :  { %2345 = vmatprep.mubr.msk.f32.mxu1 %vm336_vm1, %v314_v62 }
 0x18b   :  { %v722_v63 = vpop.trf.xlu0 }
 0x18c   :  { %2407 = vmatmul.mubr.msk.f32.gmra.mxu0 %vm336_vm1, %v722_v63 }
 0x18d   :  { %v315_v0 = vpop.trf.xlu1 }
 0x18e   :  { %2346 = vmatmul.mubr.msk.f32.gmra.mxu1 %vm336_vm1, %v315_v0  ;;  %v327_v0 = vld [vmem:[#allocation2 + $0x38] sm:$0xff] }
 0x18f   :  { %v723_v1 = vpop.trf.xlu0 }
 0x190   :  { %2409 = vmatprep.mubr.msk.f32.mxu0 %vm336_vm1, %v723_v1  ;;  %v734_v1 = vld [vmem:[#allocation2 + $0xb0] sm:$0xff] }
 0x191   :  { %v316_v2 = vpop.trf.xlu1 }
 0x192   :  { %2348 = vmatprep.mubr.msk.f32.mxu1 %vm336_vm1, %v316_v2 }
 0x193   :  { %v724_v3 = vpop.trf.xlu0 }
 0x194   :  { %2410 = vmatmul.mubr.msk.f32.gmra.mxu0 %vm336_vm1, %v724_v3 }
 0x195   :  { %v317_v4 = vpop.trf.xlu1 }
 0x196   :  { %2349 = vmatmul.mubr.msk.f32.gmra.mxu1 %vm336_vm1, %v317_v4 }
 0x197   :  { %v725_v5 = vpop.trf.xlu0 }
 0x198   :  { %2412 = vmatprep.mubr.msk.f32.mxu0 %vm336_vm1, %v725_v5  ;;  %v730_v5 = vld [vmem:[#allocation2 + $0x90] sm:$0xff] }
 0x199   :  { %v318_v6 = vpop.trf.xlu1 }
 0x19a   :  { %2351 = vmatprep.mubr.msk.f32.mxu1 %vm336_vm1, %v318_v6  ;;  %v322_v6 = vld [vmem:[#allocation2 + $0x10] sm:$0xff] }
 0x19b   :  { %v726_v7 = vpop.trf.xlu0 }
 0x19c   :  { %2413 = vmatmul.mubr.msk.f32.gmra.mxu0 %vm336_vm1, %v726_v7 }
 0x19d   :  { %v319_v8 = vpop.trf.xlu1  ;;  %2447 = vmatprep.mubr.msk.f32.mxu0 %vm2788_vm2, %v3660_v15 }
 0x19e   :  { %2352 = vmatmul.mubr.msk.f32.gmra.mxu1 %vm336_vm1, %v319_v8 }
 0x19f   :  { %2386 = vmatprep.mubr.msk.f32.mxu1 %vm2788_vm2, %v3660_v15 }
 0x1ba   :  { %v99_v11 = vpop.permute.xlu1 %98 }
 0x1bb   :  { %v260_v12 = vadd.f32 %v259_v10, %v99_v11 }
 0x1bd   :  { %1102 = vxpose.xlu1.b32.start.end [1/1] (short) %v260_v12, 128 }
 0x1c3   :  { %v104_v13 = vpop.permute.xlu0 %103 }
 0x1c4   :  { %v265_v14 = vadd.f32 %v2321_v9, %v104_v13  ;;  %v326_v13 = vld [vmem:[#allocation2 + $0x30] sm:$0xff] }
 0x1c6   :  { %1509 = vxpose.xlu0.b32.start.end [1/1] (short) %v265_v14, 128  ;;  %v736_v14 = vld [vmem:[#allocation2 + $0xc0] sm:$0xff] }
 0x217   :  { %118 = vperm.xlu1 %2602, %v64_v16  }
 0x21b   :  { %1931 = vperm.xlu1 %2602, %v1921_v17  }
 0x21f   :  { %1941 = vperm.xlu1 %2602, %v1923_v18  }
 0x224   :  { %v2393_v25 = vpop.f32.mrf.mxu0 }
 0x225   :  { %v2997_v4 = vadd.f32 %v2393_v25, %v729_v49  ;;  %v737_v25 = vld [vmem:[#allocation2 + $0xc8] sm:$0xff]  ;;  %v330_v49 = vld [vmem:[#allocation2 + $0x50] sm:$0xff] }
 0x226   :  { %v2332_v27 = vpop.f32.mrf.mxu1  ;;  %v858_v30 = vpop.f32.mrf.mxu0 }
 0x227   :  { %v3003_v9 = vadd.f32 %v2332_v27, %v321_v51  ;;  %v3005_v10 = vadd.f32 %v858_v30, %v728_v54  ;;  %v739_v27 = vld [vmem:[#allocation2 + $0xd8] sm:$0xff]  ;;  %v741_v51 = vld [vmem:[#allocation2 + $0xe8] sm:$0xff] }
 0x228   :  { %v451_v31 = vpop.f32.mrf.mxu1 }
 0x229   :  { %v3007_v11 = vadd.f32 %v451_v31, %v320_v58  ;;  %v332_v58 = vld [vmem:[#allocation2 + $0x60] sm:$0xff] }
 0x22b   :  { %123 = vperm.xlu0 %2601, %v65_v19  }
 0x22c   :  { %v2396_v32 = vpop.f32.mrf.mxu0 }
 0x22d   :  { %v3011_v17 = vadd.f32 %v2396_v32, %v731_v59  ;;  %v743_v59 = vld [vmem:[#allocation2 + $0xf8] sm:$0xff] }
 0x22e   :  { %v2335_v33 = vpop.f32.mrf.mxu1  ;;  %v868_v34 = vpop.f32.mrf.mxu0 }
 0x22f   :  { %1926 = vperm.xlu0 %2601, %v1920_v22   ;;  %v3013_v18 = vadd.f32 %v2335_v33, %v323_v61  ;;  %v3019_v30 = vadd.f32 %v868_v34, %v730_v5  ;;  %v738_v33 = vld [vmem:[#allocation2 + $0xd0] sm:$0xff] }
 0x230   :  { %v461_v35 = vpop.f32.mrf.mxu1 }
 0x231   :  { %v3021_v31 = vadd.f32 %v461_v35, %v322_v6  ;;  %v742_v6 = vld [vmem:[#allocation2 + $0xf0] sm:$0xff] }
 0x233   :  { %1936 = vperm.xlu0 %2601, %v1922_v26   ;;  %v328_v26 = vld [vmem:[#allocation2 + $0x40] sm:$0xff] }
 0x234   :  { %v2399_v36 = vpop.f32.mrf.mxu0 }
 0x235   :  { %v2993_v62 = vadd.f32 %v2399_v36, %v733_v52 }
 0x236   :  { %v2338_v37 = vpop.f32.mrf.mxu1  ;;  %v878_v38 = vpop.f32.mrf.mxu0 }
 0x237   :  { %v2995_v63 = vadd.f32 %v2338_v37, %v325_v53  ;;  %v2999_v7 = vadd.f32 %v878_v38, %v732_v55  ;;  %v938_v36 = vmax.f32 %v2997_v4, %v2993_v62  ;;  %v329_v37 = vld [vmem:[#allocation2 + $0x48] sm:$0xff] }
 0x238   :  { %v471_v39 = vpop.f32.mrf.mxu1 }
 0x239   :  { %v3001_v8 = vadd.f32 %v471_v39, %v324_v56  ;;  %v531_v32 = vmax.f32 %v3003_v9, %v2995_v63  ;;  %v740_v39 = vld [vmem:[#allocation2 + $0xe0] sm:$0xff] }
 0x23c   :  { %v2402_v40 = vpop.f32.mrf.mxu0 }
 0x23d   :  { %v3009_v12 = vadd.f32 %v2402_v40, %v735_v60  ;;  %v937_v40 = vmax.f32 %v3005_v10, %v2999_v7 }
 0x23e   :  { %v2341_v41 = vpop.f32.mrf.mxu1  ;;  %v888_v42 = vpop.f32.mrf.mxu0 }
 0x23f   :  { %v3015_v19 = vadd.f32 %v2341_v41, %v327_v0  ;;  %v3017_v22 = vadd.f32 %v888_v42, %v734_v1  ;;  %v530_v41 = vmax.f32 %v3007_v11, %v3001_v8  ;;  %v331_v42 = vld [vmem:[#allocation2 + $0x58] sm:$0xff]  ;;  %v940_v52 = vmax.f32 %v3011_v17, %v3009_v12  ;;  %v333_v0 = vld [vmem:[#allocation2 + $0x68] sm:$0xff] }
 0x240   :  { %v481_v43 = vpop.f32.mrf.mxu1 }
 0x241   :  { %v3031_v34 = vadd.f32 %v481_v43, %v326_v13  ;;  %v533_v43 = vmax.f32 %v3013_v18, %v3015_v19  ;;  %v335_v13 = vld [vmem:[#allocation2 + $0x78] sm:$0xff] }
 0x244   :  { %v2405_v44 = vpop.f32.mrf.mxu0 }
 0x245   :  { %v3037_v53 = vadd.f32 %v2405_v44, %v737_v25 }
 0x246   :  { %v2989_v45 = vpop.f32.mrf.mxu1  ;;  %v898_v46 = vpop.f32.mrf.mxu0 }
 0x247   :  { %v3033_v35 = vadd.f32 %v898_v46, %v736_v14  ;;  %v939_v46 = vmax.f32 %v3019_v30, %v3017_v22  ;;  %v3052_v44 = vadd.f32 %v2989_v45, %v329_v37  ;;  %v942_v45 = vmax.f32 %v938_v36, %v3037_v53 }
 0x248   :  { %v491_v47 = vpop.f32.mrf.mxu1 }
 0x249   :  { %v3039_v54 = vadd.f32 %v491_v47, %v328_v26  ;;  %v941_v14 = vmax.f32 %v937_v40, %v3033_v35 }
 0x24c   :  { %v2408_v48 = vpop.f32.mrf.mxu0 }
 0x24d   :  { %v3041_v55 = vadd.f32 %v2408_v48, %v739_v27 }
 0x24e   :  { %v2991_v50 = vpop.f32.mrf.mxu1  ;;  %v908_v57 = vpop.f32.mrf.mxu0 }
 0x24f   :  { %v3047_v60 = vadd.f32 %v908_v57, %v738_v33  ;;  %v3055_v47 = vadd.f32 %v2991_v50, %v331_v42  ;;  %v532_v57 = vmax.f32 %v3021_v31, %v3031_v34  ;;  %v534_v50 = vmax.f32 %v530_v41, %v3039_v54  ;;  %v334_v33 = vld [vmem:[#allocation2 + $0x70] sm:$0xff] }
 0x250   :  { %v501_v2 = vpop.f32.mrf.mxu1 }
 0x251   :  { %v3057_v48 = vadd.f32 %v501_v2, %v330_v49  ;;  %v944_v2 = vmax.f32 %v940_v52, %v3041_v55  ;;  %v535_v49 = vmax.f32 %v531_v32, %v3052_v44 }
 0x253   :  { %v536_v36 = vmax.f32 %v532_v57, %v3057_v48 }
 0x254   :  { %v2411_v3 = vpop.f32.mrf.mxu0 }
 0x255   :  { %v3059_v1 = vadd.f32 %v2411_v3, %v741_v51  ;;  %v537_v51 = vmax.f32 %v533_v43, %v3055_v47 }
 0x256   :  { %v2350_v16 = vpop.f32.mrf.mxu1  ;;  %v918_v38 = vpop.f32.mrf.mxu0 }
 0x257   :  { %v3049_v61 = vadd.f32 %v918_v38, %v740_v39  ;;  %v3069_v27 = vadd.f32 %v2350_v16, %v333_v0  ;;  %v943_v38 = vmax.f32 %v939_v46, %v3047_v60  ;;  %v946_v41 = vmax.f32 %v942_v45, %v3059_v1  ;;  %v3077_v16 = vpop.permute.xlu0 %113 }
 0x258   :  { %v511_v56 = vpop.f32.mrf.mxu1 }
 0x259   :  { %v3064_v25 = vadd.f32 %v511_v56, %v332_v58  ;;  %v945_v39 = vmax.f32 %v941_v14, %v3049_v61  ;;  %v539_v0 = vmax.f32 %v535_v49, %v3069_v27 }
 0x25b   :  { %v538_v56 = vmax.f32 %v534_v50, %v3064_v25  ;;  %v3083_v45 = vpop.permute.xlu0 %108 }
 0x25c   :  { %v2414_v5 = vpop.f32.mrf.mxu0 }
 0x25d   :  { %v934_v26 = vadd.f32 %v2414_v5, %v743_v59  ;;  %v3081_v5 = vpop.permute.xlu1 %83  ;;  %v542_v14 = vmax.f32 %v538_v56, %v539_v0 }
 0x25e   :  { %v928_v3 = vpop.f32.mrf.mxu0  ;;  %v2353_v37 = vpop.f32.mrf.mxu1  ;;  %v245_v20 = vadd.f32 %v2903_v28, %v3081_v5 }
 0x25f   :  { %v929_v42 = vadd.f32 %v928_v3, %v742_v6  ;;  %v527_v40 = vadd.f32 %v2353_v37, %v335_v13  ;;  %v948_v58 = vmax.f32 %v944_v2, %v934_v26  ;;  %v949_v6 = vmax.f32 %v945_v39, %v946_v41  ;;  %v3087_v49 = vpop.trf.xlu0 }
 0x260   :  { %v521_v52 = vpop.f32.mrf.mxu1 }
 0x261   :  { %v947_v59 = vmax.f32 %v943_v38, %v929_v42  ;;  %v522_v46 = vadd.f32 %v521_v52, %v334_v33  ;;  %v541_v13 = vmax.f32 %v537_v51, %v527_v40  ;;  %v3085_v24 = vpop.permute.xlu1 %78 }
 0x263   :  { %v950_v32 = vmax.f32 %v947_v59, %v948_v58  ;;  %v540_v43 = vmax.f32 %v536_v36, %v522_v46  ;;  %v3093_v59 = vpop.trf.xlu0 }
 0x265   :  { %v951_v57 = vmax.f32 %v949_v6, %v950_v32  ;;  %v543_v3 = vmax.f32 %v540_v43, %v541_v13  ;;  %v3089_v52 = vpop.trf.xlu1 }
 0x267   :  { %v952_v37 = vrot.slane %v951_v57, 4  ;;  %v544_v15 = vmax.f32 %v542_v14, %v543_v3 }
 0x269   :  { %v953_v50 = vmax.f32 %v951_v57, %v952_v37  ;;  %v545_v2 = vrot.slane %v544_v15, 4  ;;  %v3095_v0 = vpop.trf.xlu1 }
 0x26b   :  { %v954_v33 = vrot.slane %v953_v50, 2  ;;  %v546_v38 = vmax.f32 %v544_v15, %v545_v2  ;;  %v3113_v2 = vpop.trf.xlu0 }
 0x26d   :  { %v955_v39 = vmax.f32 %v953_v50, %v954_v33  ;;  %v547_v51 = vrot.slane %v546_v38, 2 }
 0x26f   :  { %v956_v36 = vrot.slane %v955_v39, 1  ;;  %v548_v41 = vmax.f32 %v546_v38, %v547_v51  ;;  %v3117_v38 = vpop.trf.xlu1 }
 0x271   :  { %v3091_v56 = vmax.f32 %v955_v39, %v956_v36  ;;  %v549_v58 = vrot.slane %v548_v41, 1 }
 0x273   :  { %v972_v6 = vsub.f32 %v929_v42, %v3091_v56  ;;  %v3098_v32 = vmax.f32 %v548_v41, %v549_v58  ;;  %v973_v15 = vsub.f32 %v934_v26, %v3091_v56  ;;  %v971_v13 = vsub.f32 %v3059_v1, %v3091_v56  ;;  %v3127_v58 = vpop.trf.xlu0 }
 0x274   :  { %v970_v43 = vsub.f32 %v3049_v61, %v3091_v56  ;;  %v969_v26 = vsub.f32 %v3041_v55, %v3091_v56  ;;  %v967_v36 = vsub.f32 %v3037_v53, %v3091_v56 }
 0x275   :  { %v1002_v14 = vmul.f32 1.442695, %v972_v6  ;;  %v565_v57 = vsub.f32 %v522_v46, %v3098_v32  ;;  %v1004_v3 = vmul.f32 1.442695, %v973_v15  ;;  %v566_v37 = vsub.f32 %v527_v40, %v3098_v32 }
 0x276   :  { %v564_v50 = vsub.f32 %v3069_v27, %v3098_v32  ;;  %v563_v42 = vsub.f32 %v3064_v25, %v3098_v32  ;;  %v1000_v33 = vmul.f32 1.442695, %v971_v13  ;;  %v562_v40 = vsub.f32 %v3055_v47, %v3098_v32  ;;  %v3133_v13 = vpop.trf.xlu1 }
 0x277   :  { %2603 = vpow2.f32 %v1002_v14  ;;  %v595_v1 = vmul.f32 1.442695, %v565_v57  ;;  %v597_v61 = vmul.f32 1.442695, %v566_v37  ;;  %v998_v27 = vmul.f32 1.442695, %v970_v43  ;;  %v3143_v37 = vpop.trf.xlu0 }
 0x278   :  { %2605 = vpow2.f32 %v1004_v3  ;;  %v593_v46 = vmul.f32 1.442695, %v564_v50  ;;  %v968_v25 = vsub.f32 %v3047_v60, %v3091_v56  ;;  %v591_v55 = vmul.f32 1.442695, %v563_v42 }
 0x279   :  { %2607 = vpow2.f32 %v595_v1  ;;  %v561_v39 = vsub.f32 %v3057_v48, %v3098_v32  ;;  %v996_v51 = vmul.f32 1.442695, %v969_v26  ;;  %v589_v41 = vmul.f32 1.442695, %v562_v40 }
 0x27a   :  { %2609 = vpow2.f32 %v597_v61  ;;  %v560_v47 = vsub.f32 %v3052_v44, %v3098_v32  ;;  %v994_v6 = vmul.f32 1.442695, %v968_v25  ;;  %v966_v60 = vsub.f32 %v3033_v35, %v3091_v56  ;;  %v3153_v1 = vpop.trf.xlu1 }
 0x27b   :  { %2611 = vpow2.f32 %v1000_v33  ;;  %v587_v15 = vmul.f32 1.442695, %v561_v39  ;;  %v559_v48 = vsub.f32 %v3039_v54, %v3098_v32  ;;  %v992_v53 = vmul.f32 1.442695, %v967_v36 }
 0x27c   :  { %2613 = vpow2.f32 %v593_v46  ;;  %v965_v43 = vsub.f32 %v3009_v12, %v3091_v56  ;;  %v585_v44 = vmul.f32 1.442695, %v560_v47  ;;  %v558_v14 = vsub.f32 %v3015_v19, %v3098_v32 }
 0x27d   :  { %2615 = vpow2.f32 %v998_v27  ;;  %v990_v57 = vmul.f32 1.442695, %v966_v60  ;;  %v964_v35 = vsub.f32 %v3017_v22, %v3091_v56  ;;  %v583_v3 = vmul.f32 1.442695, %v559_v48 }
 0x27e   :  { %2617 = vpow2.f32 %v591_v55  ;;  %v557_v54 = vsub.f32 %v3031_v34, %v3098_v32  ;;  %v988_v50 = vmul.f32 1.442695, %v965_v43  ;;  %v963_v12 = vsub.f32 %v2993_v62, %v3091_v56  ;;  %v3189_v60 = vpop.trf.xlu1 }
 0x27f   :  { %2619 = vpow2.f32 %v996_v51  ;;  %v581_v19 = vmul.f32 1.442695, %v558_v14  ;;  %v556_v26 = vsub.f32 %v2995_v63, %v3098_v32  ;;  %v986_v34 = vmul.f32 1.442695, %v964_v35  ;;  %v3175_v51 = vpop.trf.xlu0 }
 0x280   :  { %2621 = vpow2.f32 %v589_v41  ;;  %v962_v61 = vsub.f32 %v2999_v7, %v3091_v56  ;;  %v579_v62 = vmul.f32 1.442695, %v557_v54  ;;  %v555_v46 = vsub.f32 %v3001_v8, %v3098_v32 }
 0x281   :  { %2623 = vpow2.f32 %v994_v6  ;;  %v3670_v63 = vmov 0.0   ;;  %v984_v27 = vmul.f32 1.442695, %v963_v12  ;;  %v961_v25 = vsub.f32 %v3011_v17, %v3091_v56 }
 0x282   :  { %2625 = vpow2.f32 %v587_v15  ;;  %v577_v7 = vmul.f32 1.442695, %v556_v26  ;;  %v554_v8 = vsub.f32 %v3013_v18, %v3098_v32  ;;  %v982_v17 = vmul.f32 1.442695, %v962_v61 }
 0x283   :  { %2627 = vpow2.f32 %v992_v53  ;;  %v960_v36 = vsub.f32 %v3019_v30, %v3091_v56  ;;  %v575_v18 = vmul.f32 1.442695, %v555_v46  ;;  %v553_v47 = vsub.f32 %v3021_v31, %v3098_v32 }
 0x284   :  { %v3147_v42 = vpop.eup %2603  ;;  %2629 = vpow2.f32 %v585_v44  ;;  %v980_v30 = vmul.f32 1.442695, %v961_v25  ;;  %v959_v15 = vsub.f32 %v2997_v4, %v3091_v56  ;;  %v573_v31 = vmul.f32 1.442695, %v554_v8 }
 0x285   :  { %v3151_v22 = vpop.eup %2605  ;;  %2631 = vpow2.f32 %v990_v57  ;;  %v552_v53 = vsub.f32 %v3003_v9, %v3098_v32  ;;  %v978_v44 = vmul.f32 1.442695, %v960_v36  ;;  %v958_v4 = vsub.f32 %v3005_v10, %v3091_v56 }
 0x286   :  { %3667 = vst [vmem:[#allocation10_spill] sm:$0xff] %v3151_v22  ;;  %v3157_v33 = vpop.eup %2607  ;;  %2416 = vmatpush3.msra.mxu0 %v3151_v22  ;;  %2633 = vpow2.f32 %v583_v3  ;;  %v571_v57 = vmul.f32 1.442695, %v553_v47  ;;  %v551_v9 = vsub.f32 %v3007_v11, %v3098_v32  ;;  %v3215_v3 = vpop.trf.xlu0  ;;  %v976_v10 = vmul.f32 1.442695, %v959_v15 }
 0x287   :  { %3668 = vst [vmem:[#allocation11_spill] sm:$0xff] %v3157_v33  ;;  %v3162_v40 = vpop.eup %2609  ;;  %2417 = vmatprep.subr.mxu0 %v3670_v63  ;;  %2635 = vpow2.f32 %v988_v50  ;;  %v569_v54 = vmul.f32 1.442695, %v552_v53  ;;  %v3225_v11 = vpop.trf.xlu1  ;;  %v974_v32 = vmul.f32 1.442695, %v958_v4 }
 0x288   :  { %3669 = vst [vmem:[#allocation12_spill] sm:$0xff] %v3162_v40  ;;  %v3167_v55 = vpop.eup %2611  ;;  %2355 = vmatpush3.msra.mxu1 %v3162_v40  ;;  %2418 = vmatpush3.msra.mxu0 %v3147_v42  ;;  %2637 = vpow2.f32 %v581_v19  ;;  %v567_v19 = vmul.f32 1.442695, %v551_v9 }
 0x289   :  { %v3173_v39 = vpop.eup %2613  ;;  %2356 = vmatprep.subr.mxu1 %v3670_v63  ;;  %2419 = vmatprep.subr.mxu0 %v3670_v63  ;;  %2639 = vpow2.f32 %v986_v34 }
 0x28a   :  { %v3181_v41 = vpop.eup %2615  ;;  %2357 = vmatpush3.msra.mxu1 %v3157_v33  ;;  %2420 = vmatpush3.msra.mxu0 %v3167_v55  ;;  %2641 = vpow2.f32 %v579_v62  ;;  %v3243_v62 = vpop.trf.xlu0 }
 0x28b   :  { %v3187_v6 = vpop.eup %2617  ;;  %2421 = vmatprep.subr.mxu0 %v3670_v63  ;;  %2358 = vmatprep.subr.mxu1 %v3670_v63  ;;  %2643 = vpow2.f32 %v984_v27  ;;  %v3253_v25 = vpop.trf.xlu1 }
 0x28c   :  { %v3195_v48 = vpop.eup %2619  ;;  %2359 = vmatpush3.msra.mxu1 %v3173_v39  ;;  %2422 = vmatpush3.msra.mxu0 %v3181_v41  ;;  %2645 = vpow2.f32 %v577_v7 }
 0x28d   :  { %v3201_v43 = vpop.eup %2621  ;;  %2360 = vmatprep.subr.mxu1 %v3670_v63  ;;  %2423 = vmatprep.subr.mxu0 %v3670_v63  ;;  %2647 = vpow2.f32 %v982_v17 }
 0x28e   :  { %v3207_v14 = vpop.eup %2623  ;;  %2361 = vmatpush3.msra.mxu1 %v3187_v6  ;;  %2424 = vmatpush3.msra.mxu0 %v3195_v48  ;;  %2649 = vpow2.f32 %v575_v18  ;;  %v3267_v18 = vpop.trf.xlu0 }
 0x28f   :  { %v3213_v35 = vpop.eup %2625  ;;  %2425 = vmatprep.subr.mxu0 %v3670_v63  ;;  %2362 = vmatprep.subr.mxu1 %v3670_v63  ;;  %2651 = vpow2.f32 %v980_v30  ;;  %v3272_v15 = vpop.trf.xlu1 }
 0x290   :  { %v3219_v56 = vpop.eup %2627  ;;  %2363 = vmatpush3.msra.mxu1 %v3201_v43  ;;  %2426 = vmatpush3.msra.mxu0 %v3207_v14  ;;  %2653 = vpow2.f32 %v573_v31 }
 0x291   :  { %v3223_v50 = vpop.eup %2629  ;;  %2364 = vmatprep.subr.mxu1 %v3670_v63  ;;  %2427 = vmatprep.subr.mxu0 %v3670_v63  ;;  %2655 = vpow2.f32 %v978_v44 }
 0x292   :  { %v3229_v12 = vpop.eup %2631  ;;  %2365 = vmatpush3.msra.mxu1 %v3213_v35  ;;  %2428 = vmatpush3.msra.mxu0 %v3219_v56  ;;  %2657 = vpow2.f32 %v571_v57  ;;  %v3278_v57 = vpop.trf.xlu0 }
 0x293   :  { %v3233_v26 = vpop.eup %2633  ;;  %2429 = vmatprep.subr.mxu0 %v3670_v63  ;;  %2366 = vmatprep.subr.mxu1 %v3670_v63  ;;  %2659 = vpow2.f32 %v976_v10 }
 0x294   :  { %v3237_v34 = vpop.eup %2635  ;;  %2367 = vmatpush3.msra.mxu1 %v3223_v50  ;;  %2430 = vmatpush3.msra.mxu0 %v3229_v12  ;;  %2661 = vpow2.f32 %v569_v54  ;;  %v275_v54 = vadd.f32 %v2977_v21, %v3077_v16  ;;  %v240_v21 = vadd.f32 %v2905_v29, %v3085_v24  ;;  %v270_v16 = vadd.f32 %v2982_v23, %v3083_v45 }
 0x295   :  { %v3241_v61 = vpop.eup %2637  ;;  %2368 = vmatprep.subr.mxu1 %v3670_v63  ;;  %2431 = vmatprep.subr.mxu0 %v3670_v63  ;;  %2663 = vpow2.f32 %v974_v32  ;;  %v3284_v32 = vpop.trf.xlu1 }
 0x296   :  { %v3247_v46 = vpop.eup %2639  ;;  %2369 = vmatpush3.msra.mxu1 %v3233_v26  ;;  %2432 = vmatpush3.msra.mxu0 %v3237_v34  ;;  %2665 = vpow2.f32 %v567_v19 }
 0x297   :  { %v3251_v27 = vpop.eup %2641  ;;  %2433 = vmatprep.subr.mxu0 %v3670_v63  ;;  %2370 = vmatprep.subr.mxu1 %v3670_v63 }
 0x298   :  { %v3257_v7 = vpop.eup %2643  ;;  %2371 = vmatpush3.msra.mxu1 %v3241_v61  ;;  %2434 = vmatpush3.msra.mxu0 %v3247_v46 }
 0x299   :  { %v3261_v8 = vpop.eup %2645  ;;  %2372 = vmatprep.subr.mxu1 %v3670_v63  ;;  %2435 = vmatprep.subr.mxu0 %v3670_v63 }
 0x29a   :  { %v2648_v17 = vpop.eup %2647  ;;  %2373 = vmatpush3.msra.mxu1 %v3251_v27  ;;  %2436 = vmatpush3.msra.mxu0 %v3257_v7 }
 0x29b   :  { %v2650_v36 = vpop.eup %2649  ;;  %2437 = vmatprep.subr.mxu0 %v3670_v63  ;;  %2374 = vmatprep.subr.mxu1 %v3670_v63 }
 0x29c   :  { %v2652_v47 = vpop.eup %2651  ;;  %2375 = vmatpush3.msra.mxu1 %v3261_v8  ;;  %2438 = vmatpush3.msra.mxu0 %v2648_v17 }
 0x29d   :  { %v2654_v30 = vpop.eup %2653  ;;  %2376 = vmatprep.subr.mxu1 %v3670_v63  ;;  %2439 = vmatprep.subr.mxu0 %v3670_v63 }
 0x29e   :  { %v2656_v31 = vpop.eup %2655  ;;  %2377 = vmatpush3.msra.mxu1 %v2650_v36  ;;  %2440 = vmatpush3.msra.mxu0 %v2652_v47 }
 0x29f   :  { %v2658_v53 = vpop.eup %2657  ;;  %2378 = vmatprep.subr.mxu1 %v3670_v63  ;;  %2441 = vmatprep.subr.mxu0 %v3670_v63 }
 0x2a0   :  { %v2660_v44 = vpop.eup %2659  ;;  %2379 = vmatpush3.msra.mxu1 %v2654_v30  ;;  %2442 = vmatpush3.msra.mxu0 %v2656_v31 }
 0x2a1   :  { %v2662_v4 = vpop.eup %2661  ;;  %2380 = vmatprep.subr.mxu1 %v3670_v63  ;;  %2443 = vmatprep.subr.mxu0 %v3670_v63 }
 0x2a2   :  { %v2664_v9 = vpop.eup %2663  ;;  %2381 = vmatpush3.msra.mxu1 %v2658_v53  ;;  %2444 = vmatpush3.msra.mxu0 %v2660_v44 }
 0x2a3   :  { %v2666_v10 = vpop.eup %2665  ;;  %2382 = vmatprep.subr.mxu1 %v3670_v63  ;;  %2445 = vmatprep.subr.mxu0 %v3670_v63  ;;  %v1006_v19 = vadd.f32 %v2664_v9, %v2660_v44  ;;  %v1535_v44 = vpop.trf.xlu0 }
 0x2a4   :  { %2383 = vmatpush3.msra.mxu1 %v2662_v4  ;;  %2446 = vmatpush3.msra.mxu0 %v2664_v9  ;;  %v599_v40 = vadd.f32 %v2666_v10, %v2662_v4  ;;  %v1128_v4 = vpop.trf.xlu1 }
 0x2a5   :  { %2384 = vmatprep.subr.mxu1 %v3670_v63  ;;  %2448 = vmatmul.mubr.f32.vlgmr.msra.gmra.mxu0 %v275_v54  ;;  %v1007_v22 = vadd.f32 %v2656_v31, %v1006_v19 }
 0x2a6   :  { %2511 = vmatprep.subr.mxu0 %v245_v20  ;;  %2385 = vmatpush3.msra.mxu1 %v2666_v10  ;;  %v600_v33 = vadd.f32 %v2658_v53, %v599_v40 }
 0x2a7   :  { %2512 = vmatpush3.msra.mxu0 %v245_v20  ;;  %2513 = vmatprep.mubr.msk.f32.mxu0 %vm336_vm1, %v3087_v49  ;;  %v1008_v28 = vadd.f32 %v2652_v47, %v1007_v22  ;;  %v1536_v45 = vpop.trf.xlu0 }
 0x2a8   :  { %2387 = vmatmul.mubr.f32.vlgmr.msra.gmra.mxu1 %v270_v16  ;;  %2450 = vmatprep.subr.mxu1 %v240_v21  ;;  %v601_v5 = vadd.f32 %v2654_v30, %v600_v33 }
 0x2a9   :  { %2451 = vmatpush3.msra.mxu1 %v240_v21  ;;  %2452 = vmatprep.mubr.msk.f32.mxu1 %vm336_vm1, %v3089_v52  ;;  %v1009_v29 = vadd.f32 %v2648_v17, %v1008_v28 }
 0x2aa   :  { %2514 = vmatmul.mubr.msk.f32.vlgmr.msra.gmra.mxu0 %vm336_vm1, %v3093_v59  ;;  %v602_v23 = vadd.f32 %v2650_v36, %v601_v5  ;;  %2537 = vmatprep.subr.mxu0 %v3670_v63  ;;  %v1129_v59 = vpop.trf.xlu1 }
 0x2ab   :  { %2516 = vmatprep.mubr.msk.f32.mxu0 %vm336_vm1, %v3113_v2  ;;  %v1010_v20 = vadd.f32 %v3257_v7, %v1009_v29  ;;  %2476 = vmatprep.subr.mxu1 %v3670_v63  ;;  %v1537_v22 = vpop.trf.xlu0 }
 0x2ac   :  { %2453 = vmatmul.mubr.msk.f32.vlgmr.msra.gmra.mxu1 %vm336_vm1, %v3095_v0  ;;  %v603_v24 = vadd.f32 %v3261_v8, %v602_v23 }
 0x2ad   :  { %2455 = vmatprep.mubr.msk.f32.mxu1 %vm336_vm1, %v3117_v38  ;;  %v1011_v49 = vadd.f32 %v3247_v46, %v1010_v20 }
 0x2ae   :  { %2517 = vmatmul.mubr.msk.f32.gmra.mxu0 %vm336_vm1, %v3127_v58  ;;  %v604_v52 = vadd.f32 %v3251_v27, %v603_v24  ;;  %v1130_v33 = vpop.trf.xlu1 }
 0x2af   :  { %2519 = vmatprep.mubr.msk.f32.mxu0 %vm336_vm1, %v3143_v37  ;;  %v1012_v2 = vadd.f32 %v3237_v34, %v1011_v49 }
 0x2b0   :  { %2456 = vmatmul.mubr.msk.f32.gmra.mxu1 %vm336_vm1, %v3133_v13  ;;  %v605_v0 = vadd.f32 %v3241_v61, %v604_v52 }
 0x2b1   :  { %2458 = vmatprep.mubr.msk.f32.mxu1 %vm336_vm1, %v3153_v1  ;;  %v1013_v38 = vadd.f32 %v3229_v12, %v1012_v2 }
 0x2b2   :  { %2520 = vmatmul.mubr.msk.f32.gmra.mxu0 %vm336_vm1, %v3175_v51  ;;  %v606_v58 = vadd.f32 %v3233_v26, %v605_v0 }
 0x2b3   :  { %2522 = vmatprep.mubr.msk.f32.mxu0 %vm336_vm1, %v3215_v3  ;;  %v1014_v37 = vadd.f32 %v3219_v56, %v1013_v38  ;;  %v1538_v3 = vpop.trf.xlu0  ;;  %v1131_v56 = vpop.trf.xlu1 }
 0x2b4   :  { %2459 = vmatmul.mubr.msk.f32.gmra.mxu1 %vm336_vm1, %v3189_v60  ;;  %v607_v13 = vadd.f32 %v3223_v50, %v606_v58 }
 0x2b5   :  { %2461 = vmatprep.mubr.msk.f32.mxu1 %vm336_vm1, %v3225_v11  ;;  %v1015_v1 = vadd.f32 %v3207_v14, %v1014_v37 }
 0x2b6   :  { %2523 = vmatmul.mubr.msk.f32.gmra.mxu0 %vm336_vm1, %v3243_v62  ;;  %v608_v40 = vadd.f32 %v3213_v35, %v607_v13 }
 0x2b7   :  { %2525 = vmatprep.mubr.msk.f32.mxu0 %vm336_vm1, %v3267_v18  ;;  %v1016_v51 = vadd.f32 %v3195_v48, %v1015_v1  ;;  %v1539_v12 = vpop.trf.xlu0  ;;  %v1132_v61 = vpop.trf.xlu1 }
 0x2b8   :  { %2462 = vmatmul.mubr.msk.f32.gmra.mxu1 %vm336_vm1, %v3253_v25  ;;  %v609_v60 = vadd.f32 %v3201_v43, %v608_v40  ;;  %v1543_v40 = vld [vmem:[#allocation2 + $0x188] sm:$0xff] }
 0x2b9   :  { %2464 = vmatprep.mubr.msk.f32.mxu1 %vm336_vm1, %v3272_v15  ;;  %v1017_v14 = vadd.f32 %v3181_v41, %v1016_v51  ;;  %v3671_v41 = vld [vmem:[#allocation11_spill] sm:$0xff]  ;;  %v1136_v51 = vld [vmem:[#allocation2 + $0x108] sm:$0xff] }
 0x2ba   :  { %2526 = vmatmul.mubr.msk.f32.gmra.mxu0 %vm336_vm1, %v3278_v57  ;;  %v610_v35 = vadd.f32 %v3187_v6, %v609_v60  ;;  %v3672_v6 = vld [vmem:[#allocation10_spill] sm:$0xff]  ;;  %v1542_v60 = vld [vmem:[#allocation2 + $0x180] sm:$0xff] }
 0x2bb   :  { %2528 = vmatprep.mubr.msk.f32.mxu0 %vm336_vm1, %v1535_v44  ;;  %v1018_v48 = vadd.f32 %v3167_v55, %v1017_v14  ;;  %v3673_v55 = vld [vmem:[#allocation12_spill] sm:$0xff]  ;;  %v1140_v14 = vld [vmem:[#allocation2 + $0x128] sm:$0xff] }
 0x2bc   :  { %2465 = vmatmul.mubr.msk.f32.gmra.mxu1 %vm336_vm1, %v3284_v32  ;;  %v611_v43 = vadd.f32 %v3173_v39, %v610_v35  ;;  %v1133_v39 = vpop.trf.xlu1 }
 0x2bd   :  { %2467 = vmatprep.mubr.msk.f32.mxu1 %vm336_vm1, %v1128_v4  ;;  %v1019_v50 = vadd.f32 %v3147_v42, %v1018_v48  ;;  %v1540_v42 = vpop.trf.xlu0  ;;  %v1135_v48 = vld [vmem:[#allocation2 + $0x100] sm:$0xff] }
 0x2be   :  { %2529 = vmatmul.mubr.msk.f32.gmra.mxu0 %vm336_vm1, %v1536_v45  ;;  %v612_v11 = vadd.f32 %v3671_v41, %v611_v43  ;;  %v1546_v43 = vld [vmem:[#allocation2 + $0x1a0] sm:$0xff]  ;;  %v1545_v41 = vld [vmem:[#allocation2 + $0x198] sm:$0xff] }
 0x2bf   :  { %2531 = vmatprep.mubr.msk.f32.mxu0 %vm336_vm1, %v1537_v22  ;;  %v1020_v26 = vadd.f32 %v3672_v6, %v1019_v50  ;;  %v1139_v50 = vld [vmem:[#allocation2 + $0x120] sm:$0xff] }
 0x2c0   :  { %2468 = vmatmul.mubr.msk.f32.gmra.mxu1 %vm336_vm1, %v1129_v59  ;;  %v613_v34 = vadd.f32 %v3673_v55, %v612_v11  ;;  %v1549_v11 = vld [vmem:[#allocation2 + $0x1b8] sm:$0xff] }
 0x2c1   :  { %2470 = vmatprep.mubr.msk.f32.mxu1 %vm336_vm1, %v1130_v33  ;;  %v1021_v62 = vrot.slane %v1020_v26, 4  ;;  %v1138_v55 = vld [vmem:[#allocation2 + $0x118] sm:$0xff] }
 0x2c2   :  { %2532 = vmatmul.mubr.msk.f32.gmra.mxu0 %vm336_vm1, %v1538_v3  ;;  %v614_v46 = vrot.slane %v613_v34, 4  ;;  %v1547_v3 = vld [vmem:[#allocation2 + $0x1a8] sm:$0xff] }
 0x2c3   :  { %2534 = vmatprep.mubr.msk.f32.mxu0 %vm336_vm1, %v1539_v12  ;;  %v1022_v27 = vadd.f32 %v1021_v62, %v1020_v26  ;;  %v1142_v12 = vld [vmem:[#allocation2 + $0x138] sm:$0xff] }
 0x2c4   :  { %2471 = vmatmul.mubr.msk.f32.gmra.mxu1 %vm336_vm1, %v1131_v56  ;;  %v615_v25 = vadd.f32 %v614_v46, %v613_v34  ;;  %v1544_v34 = vld [vmem:[#allocation2 + $0x190] sm:$0xff] }
 0x2c5   :  { %2473 = vmatprep.mubr.msk.f32.mxu1 %vm336_vm1, %v1132_v61  ;;  %v1023_v7 = vrot.slane %v1022_v27, 2 }
 0x2c6   :  { %2535 = vmatmul.mubr.msk.f32.gmra.mxu0 %vm336_vm1, %v1540_v42  ;;  %v616_v8 = vrot.slane %v615_v25, 2 }
 0x2c7   :  { %2569 = vmatprep.mubr.msk.f32.mxu0 %vm2788_vm2, %v3670_v63  ;;  %v1024_v17 = vadd.f32 %v1023_v7, %v1022_v27  ;;  %v1137_v27 = vld [vmem:[#allocation2 + $0x110] sm:$0xff] }
 0x2c8   :  { %2474 = vmatmul.mubr.msk.f32.gmra.mxu1 %vm336_vm1, %v1133_v39  ;;  %v617_v36 = vadd.f32 %v616_v8, %v615_v25  ;;  %v1548_v39 = vld [vmem:[#allocation2 + $0x1b0] sm:$0xff] }
 0x2c9   :  { %2508 = vmatprep.mubr.msk.f32.mxu1 %vm2788_vm2, %v3670_v63  ;;  %v1025_v18 = vrot.slane %v1024_v17, 1  ;;  %v1141_v8 = vld [vmem:[#allocation2 + $0x130] sm:$0xff] }
 0x2ca   :  { %v618_v47 = vrot.slane %v617_v36, 1 }
 0x2cb   :  { %v1026_v30 = vadd.f32 %v1025_v18, %v1024_v17 }
 0x2cc   :  { %v619_v15 = vadd.f32 %v618_v47, %v617_v36 }
 0x2cd   :  { %2667 = vrcp.f32 %v1026_v30 }
 0x2ce   :  { %2669 = vrcp.f32 %v619_v15 }
 0x2da   :  { %v2668_v31 = vpop.eup %2667 }
 0x2db   :  { %v2670_v53 = vpop.eup %2669  ;;  %v1028_v57 = vmul.f32 %v2668_v31, %v1026_v30 }
 0x2dc   :  { %v621_v9 = vmul.f32 %v2670_v53, %v619_v15 }
 0x2dd   :  { %v1029_v10 = vsub.f32 2.0, %v1028_v57 }
 0x2de   :  { %v622_v54 = vsub.f32 2.0, %v621_v9 }
 0x2df   :  { %v1030_v32 = vmul.f32 %v2668_v31, %v1029_v10  ;;  %v1551_v31 = vld [vmem:[#allocation2 + $0x1c8] sm:$0xff] }
 0x2e0   :  { %v623_v16 = vmul.f32 %v2670_v53, %v622_v54  ;;  %v1550_v53 = vld [vmem:[#allocation2 + $0x1c0] sm:$0xff] }
 0x365   :  { %v1097_v19 = vpop.f32.mrf.mxu0 }
 0x366   :  { %v3375_v21 = vmul.f32 %v1097_v19, %v1030_v32  ;;  %v1144_v32 = vld [vmem:[#allocation2 + $0x148] sm:$0xff]  ;;  %v1143_v19 = vld [vmem:[#allocation2 + $0x140] sm:$0xff] }
 0x367   :  { %v2449_v44 = vpop.f32.mrf.mxu0 }
 0x368   :  { %v690_v28 = vpop.f32.mrf.mxu1 }
 0x369   :  { %v3377_v5 = vmul.f32 %v690_v28, %v623_v16 }
 0x36a   :  { %v2388_v4 = vpop.f32.mrf.mxu1  ;;  %v2515_v29 = vpop.f32.mrf.mxu0 }
 0x36b   :  { %v3383_v62 = vadd.f32 %v2515_v29, %v1543_v40 }
 0x36c   :  { %v2454_v23 = vpop.f32.mrf.mxu1  ;;  %v1672_v20 = vpop.f32.mrf.mxu0 }
 0x36d   :  { %v3385_v46 = vadd.f32 %v2454_v23, %v1136_v51  ;;  %v3391_v18 = vadd.f32 %v1672_v20, %v1542_v60  ;;  %v1553_v20 = vld [vmem:[#allocation2 + $0x1d8] sm:$0xff]  ;;  %v1555_v60 = vld [vmem:[#allocation2 + $0x1e8] sm:$0xff] }
 0x36e   :  { %v1265_v24 = vpop.f32.mrf.mxu1  ;;  %v2518_v45 = vpop.f32.mrf.mxu0 }
 0x36f   :  { %v3393_v47 = vadd.f32 %v1265_v24, %v1135_v48  ;;  %v3399_v57 = vadd.f32 %v2518_v45, %v1545_v41  ;;  %v1552_v24 = vld [vmem:[#allocation2 + $0x1d0] sm:$0xff]  ;;  %v1554_v45 = vld [vmem:[#allocation2 + $0x1e0] sm:$0xff]  ;;  %v1148_v48 = vld [vmem:[#allocation2 + $0x168] sm:$0xff] }
 0x370   :  { %v2457_v49 = vpop.f32.mrf.mxu1  ;;  %v1682_v52 = vpop.f32.mrf.mxu0 }
 0x371   :  { %v3401_v9 = vadd.f32 %v2457_v49, %v1138_v55  ;;  %v3403_v10 = vadd.f32 %v1682_v52, %v1544_v34  ;;  %v1556_v34 = vld [vmem:[#allocation2 + $0x1f0] sm:$0xff] }
 0x372   :  { %v1275_v59 = vpop.f32.mrf.mxu1  ;;  %v2521_v2 = vpop.f32.mrf.mxu0 }
 0x373   :  { %v3379_v61 = vadd.f32 %v2521_v2, %v1547_v3  ;;  %v3407_v28 = vadd.f32 %v1275_v59, %v1137_v27 }
 0x374   :  { %v2460_v0 = vpop.f32.mrf.mxu1  ;;  %v1692_v38 = vpop.f32.mrf.mxu0 }
 0x375   :  { %v3381_v42 = vadd.f32 %v2460_v0, %v1140_v14  ;;  %v3387_v25 = vadd.f32 %v1692_v38, %v1546_v43  ;;  %v1752_v4 = vmax.f32 %v3383_v62, %v3379_v61  ;;  %v1146_v0 = vld [vmem:[#allocation2 + $0x158] sm:$0xff]  ;;  %v1145_v38 = vld [vmem:[#allocation2 + $0x150] sm:$0xff] }
 0x376   :  { %v1285_v58 = vpop.f32.mrf.mxu1  ;;  %v2524_v22 = vpop.f32.mrf.mxu0 }
 0x377   :  { %v3389_v7 = vadd.f32 %v1285_v58, %v1139_v50  ;;  %v3395_v30 = vadd.f32 %v2524_v22, %v1549_v11  ;;  %v1345_v29 = vmax.f32 %v3385_v46, %v3381_v42  ;;  %v1751_v49 = vmax.f32 %v3391_v18, %v3387_v25  ;;  %v1150_v11 = vld [vmem:[#allocation2 + $0x178] sm:$0xff] }
 0x378   :  { %v2463_v37 = vpop.f32.mrf.mxu1  ;;  %v1702_v13 = vpop.f32.mrf.mxu0 }
 0x379   :  { %v3397_v15 = vadd.f32 %v2463_v37, %v1142_v12  ;;  %v3405_v54 = vadd.f32 %v1702_v13, %v1548_v39  ;;  %v1344_v52 = vmax.f32 %v3393_v47, %v3389_v7  ;;  %v1147_v37 = vld [vmem:[#allocation2 + $0x160] sm:$0xff]  ;;  %v1754_v13 = vmax.f32 %v3399_v57, %v3395_v30 }
 0x37a   :  { %v1295_v33 = vpop.f32.mrf.mxu1  ;;  %v2527_v1 = vpop.f32.mrf.mxu0 }
 0x37b   :  { %v3413_v23 = vadd.f32 %v1295_v33, %v1141_v8  ;;  %v3419_v2 = vadd.f32 %v2527_v1, %v1551_v31  ;;  %v1347_v33 = vmax.f32 %v3401_v9, %v3397_v15  ;;  %v1557_v1 = vld [vmem:[#allocation2 + $0x1f8] sm:$0xff]  ;;  %v1753_v3 = vmax.f32 %v3403_v10, %v3405_v54 }
 0x37c   :  { %v2466_v35 = vpop.f32.mrf.mxu1  ;;  %v1712_v56 = vpop.f32.mrf.mxu0 }
 0x37d   :  { %v3421_v59 = vadd.f32 %v1712_v56, %v1550_v53  ;;  %v3427_v40 = vadd.f32 %v2466_v35, %v1144_v32  ;;  %v1346_v35 = vmax.f32 %v3407_v28, %v3413_v23  ;;  %v1149_v53 = vld [vmem:[#allocation2 + $0x170] sm:$0xff] }
 0x37e   :  { %v1305_v6 = vpop.f32.mrf.mxu1  ;;  %v2530_v26 = vpop.f32.mrf.mxu0 }
 0x37f   :  { %v3429_v51 = vadd.f32 %v1305_v6, %v1143_v19  ;;  %v3433_v14 = vadd.f32 %v2530_v26, %v1553_v20  ;;  %v1756_v26 = vmax.f32 %v1752_v4, %v3419_v2  ;;  %v1755_v39 = vmax.f32 %v1751_v49, %v3421_v59 }
 0x380   :  { %v2469_v17 = vpop.f32.mrf.mxu1  ;;  %v1722_v36 = vpop.f32.mrf.mxu0  ;;  %v1349_v32 = vmax.f32 %v1345_v29, %v3427_v40 }
 0x381   :  { %v3435_v56 = vadd.f32 %v1722_v36, %v1552_v24  ;;  %v3441_v12 = vadd.f32 %v2469_v17, %v1146_v0  ;;  %v1348_v19 = vmax.f32 %v1344_v52, %v3429_v51 }
 0x382   :  { %v1315_v16 = vpop.f32.mrf.mxu1  ;;  %v2533_v44 = vpop.f32.mrf.mxu0 }
 0x383   :  { %v3443_v6 = vadd.f32 %v1315_v16, %v1145_v38  ;;  %v1738_v27 = vadd.f32 %v2533_v44, %v1555_v60  ;;  %v1758_v16 = vmax.f32 %v1754_v13, %v3433_v14  ;;  %v1757_v24 = vmax.f32 %v1753_v3, %v3435_v56 }
 0x384   :  { %v2472_v58 = vpop.f32.mrf.mxu1  ;;  %v1732_v22 = vpop.f32.mrf.mxu0  ;;  %v1351_v44 = vmax.f32 %v1347_v33, %v3441_v12 }
 0x385   :  { %v3437_v43 = vadd.f32 %v1732_v22, %v1554_v45  ;;  %v1331_v17 = vadd.f32 %v2472_v58, %v1148_v48  ;;  %v1350_v49 = vmax.f32 %v1346_v35, %v3443_v6  ;;  %v1760_v29 = vmax.f32 %v1756_v26, %v1738_v27 }
 0x386   :  { %v1325_v50 = vpop.f32.mrf.mxu1  ;;  %v2536_v41 = vpop.f32.mrf.mxu0 }
 0x387   :  { %v3445_v55 = vadd.f32 %v1325_v50, %v1147_v37  ;;  %v1748_v8 = vadd.f32 %v2536_v41, %v1557_v1  ;;  %v1759_v45 = vmax.f32 %v1755_v39, %v3437_v43  ;;  %v1353_v58 = vmax.f32 %v1349_v32, %v1331_v17 }
 0x388   :  { %v2475_v36 = vpop.f32.mrf.mxu1  ;;  %v1742_v31 = vpop.f32.mrf.mxu0 }
 0x389   :  { %v1341_v20 = vadd.f32 %v2475_v36, %v1150_v11  ;;  %v1743_v4 = vadd.f32 %v1742_v31, %v1556_v34  ;;  %v1352_v38 = vmax.f32 %v1348_v19, %v3445_v55  ;;  %v1762_v37 = vmax.f32 %v1758_v16, %v1748_v8 }
 0x38a   :  { %v1335_v0 = vpop.f32.mrf.mxu1  ;;  %v1763_v13 = vmax.f32 %v1759_v45, %v1760_v29 }
 0x38b   :  { %v1336_v22 = vadd.f32 %v1335_v0, %v1149_v53  ;;  %v1761_v52 = vmax.f32 %v1757_v24, %v1743_v4  ;;  %v1355_v60 = vmax.f32 %v1351_v44, %v1341_v20  ;;  %v1356_v3 = vmax.f32 %v1352_v38, %v1353_v58 }
 0x38d   :  { %v1354_v1 = vmax.f32 %v1350_v49, %v1336_v22  ;;  %v1764_v48 = vmax.f32 %v1761_v52, %v1762_v37 }
 0x38f   :  { %v1357_v50 = vmax.f32 %v1354_v1, %v1355_v60  ;;  %v1765_v41 = vmax.f32 %v1763_v13, %v1764_v48 }
 0x391   :  { %v1358_v11 = vmax.f32 %v1356_v3, %v1357_v50  ;;  %v1766_v34 = vrot.slane %v1765_v41, 4 }
 0x393   :  { %v1359_v39 = vrot.slane %v1358_v11, 4  ;;  %v1767_v33 = vmax.f32 %v1765_v41, %v1766_v34 }
 0x395   :  { %v1360_v36 = vmax.f32 %v1358_v11, %v1359_v39  ;;  %v1768_v35 = vrot.slane %v1767_v33, 2 }
 0x397   :  { %v1361_v31 = vrot.slane %v1360_v36, 2  ;;  %v1769_v19 = vmax.f32 %v1767_v33, %v1768_v35 }
 0x399   :  { %v1362_v53 = vmax.f32 %v1360_v36, %v1361_v31  ;;  %v1770_v26 = vrot.slane %v1769_v19, 1 }
 0x39b   :  { %v1363_v16 = vrot.slane %v1362_v53, 1  ;;  %v3457_v24 = vmax.f32 %v1769_v19, %v1770_v26 }
 0x39d   :  { %v3459_v32 = vmax.f32 %v1362_v53, %v1363_v16  ;;  %v1786_v45 = vsub.f32 %v1743_v4, %v3457_v24  ;;  %v1787_v0 = vsub.f32 %v1748_v8, %v3457_v24  ;;  %v1785_v44 = vsub.f32 %v1738_v27, %v3457_v24 }
 0x39e   :  { %v1784_v58 = vsub.f32 %v3437_v43, %v3457_v24  ;;  %v1783_v27 = vsub.f32 %v3433_v14, %v3457_v24  ;;  %v1782_v43 = vsub.f32 %v3435_v56, %v3457_v24  ;;  %v1781_v14 = vsub.f32 %v3419_v2, %v3457_v24 }
 0x39f   :  { %v1379_v49 = vsub.f32 %v1336_v22, %v3459_v32  ;;  %v1380_v38 = vsub.f32 %v1341_v20, %v3459_v32  ;;  %v1378_v29 = vsub.f32 %v1331_v17, %v3459_v32  ;;  %v1816_v37 = vmul.f32 1.442695, %v1786_v45 }
 0x3a0   :  { %v1818_v52 = vmul.f32 1.442695, %v1787_v0  ;;  %v1377_v4 = vsub.f32 %v3445_v55, %v3459_v32  ;;  %v1814_v8 = vmul.f32 1.442695, %v1785_v44  ;;  %v1376_v17 = vsub.f32 %v3441_v12, %v3459_v32 }
 0x3a1   :  { %v1409_v60 = vmul.f32 1.442695, %v1379_v49  ;;  %v1411_v1 = vmul.f32 1.442695, %v1380_v38  ;;  %2671 = vpow2.f32 %v1816_v37  ;;  %v1407_v22 = vmul.f32 1.442695, %v1378_v29 }
 0x3a2   :  { %v1812_v20 = vmul.f32 1.442695, %v1784_v58  ;;  %v1405_v13 = vmul.f32 1.442695, %v1377_v4  ;;  %v1375_v55 = vsub.f32 %v3443_v6, %v3459_v32  ;;  %v1810_v48 = vmul.f32 1.442695, %v1783_v27 }
 0x3a3   :  { %2673 = vpow2.f32 %v1409_v60  ;;  %v1403_v3 = vmul.f32 1.442695, %v1376_v17  ;;  %v1374_v12 = vsub.f32 %v3427_v40, %v3459_v32  ;;  %v1808_v50 = vmul.f32 1.442695, %v1782_v43 }
 0x3a4   :  { %2675 = vpow2.f32 %v1818_v52  ;;  %v1780_v56 = vsub.f32 %v3421_v59, %v3457_v24  ;;  %v1401_v41 = vmul.f32 1.442695, %v1375_v55  ;;  %v1373_v6 = vsub.f32 %v3429_v51, %v3459_v32 }
 0x3a5   :  { %2677 = vpow2.f32 %v1411_v1  ;;  %v1806_v11 = vmul.f32 1.442695, %v1781_v14  ;;  %v1779_v2 = vsub.f32 %v3395_v30, %v3457_v24  ;;  %v1399_v34 = vmul.f32 1.442695, %v1374_v12 }
 0x3a6   :  { %2679 = vpow2.f32 %v1814_v8  ;;  %v1372_v40 = vsub.f32 %v3397_v15, %v3459_v32  ;;  %v1804_v39 = vmul.f32 1.442695, %v1780_v56  ;;  %v1778_v59 = vsub.f32 %v3405_v54, %v3457_v24 }
 0x3a7   :  { %2681 = vpow2.f32 %v1407_v22  ;;  %v1397_v33 = vmul.f32 1.442695, %v1373_v6  ;;  %v1371_v51 = vsub.f32 %v3413_v23, %v3459_v32  ;;  %v1802_v36 = vmul.f32 1.442695, %v1779_v2 }
 0x3a8   :  { %2683 = vpow2.f32 %v1812_v20  ;;  %v1777_v30 = vsub.f32 %v3379_v61, %v3457_v24  ;;  %v1395_v31 = vmul.f32 1.442695, %v1372_v40  ;;  %v1370_v15 = vsub.f32 %v3381_v42, %v3459_v32 }
 0x3a9   :  { %2685 = vpow2.f32 %v1405_v13  ;;  %v1800_v54 = vmul.f32 1.442695, %v1778_v59  ;;  %v1776_v53 = vsub.f32 %v3387_v25, %v3457_v24  ;;  %v1393_v26 = vmul.f32 1.442695, %v1371_v51  ;;  %v124_v59 = vpop.permute.xlu0 %123  ;;  %v119_v51 = vpop.permute.xlu1 %118 }
 0x3aa   :  { %2687 = vpow2.f32 %v1810_v48  ;;  %v1369_v61 = vsub.f32 %v3389_v7, %v3459_v32  ;;  %v1798_v42 = vmul.f32 1.442695, %v1777_v30  ;;  %v1775_v45 = vsub.f32 %v3399_v57, %v3457_v24 }
 0x3ab   :  { %2689 = vpow2.f32 %v1403_v3  ;;  %v1391_v25 = vmul.f32 1.442695, %v1370_v15  ;;  %v1368_v7 = vsub.f32 %v3401_v9, %v3459_v32  ;;  %v1796_v49 = vmul.f32 1.442695, %v1776_v53  ;;  %v3675_v53 = vld [vmem:[#allocation9_spill] sm:$0xff] }
 0x3ac   :  { %2691 = vpow2.f32 %v1808_v50  ;;  %v1774_v57 = vsub.f32 %v3403_v10, %v3457_v24  ;;  %v1389_v29 = vmul.f32 1.442695, %v1369_v61  ;;  %v1367_v9 = vsub.f32 %v3407_v28, %v3459_v32 }
 0x3ad   :  { %2693 = vpow2.f32 %v1401_v41  ;;  %v1794_v52 = vmul.f32 1.442695, %v1775_v45  ;;  %v1773_v10 = vsub.f32 %v3383_v62, %v3457_v24  ;;  %v1387_v60 = vmul.f32 1.442695, %v1368_v7 }
 0x3ae   :  { %2695 = vpow2.f32 %v1806_v11  ;;  %v3497_v35 = vpop.eup %2671  ;;  %v1366_v28 = vsub.f32 %v3385_v46, %v3459_v32  ;;  %v1792_v4 = vmul.f32 1.442695, %v1774_v57  ;;  %v1772_v62 = vsub.f32 %v3391_v18, %v3457_v24 }
 0x3af   :  { %2697 = vpow2.f32 %v1399_v34  ;;  %v1385_v27 = vmul.f32 1.442695, %v1367_v9  ;;  %v1365_v46 = vsub.f32 %v3393_v47, %v3459_v32  ;;  %v1790_v17 = vmul.f32 1.442695, %v1773_v10 }
 0x3b0   :  { %v3501_v19 = vpop.eup %2673  ;;  %2699 = vpow2.f32 %v1804_v39  ;;  %v1383_v24 = vmul.f32 1.442695, %v1366_v28  ;;  %v1788_v47 = vmul.f32 1.442695, %v1772_v62 }
 0x3b1   :  { %v3505_v23 = vpop.eup %2675  ;;  %2701 = vpow2.f32 %v1397_v33  ;;  %v1381_v43 = vmul.f32 1.442695, %v1365_v46 }
 0x3b2   :  { %v3509_v16 = vpop.eup %2677  ;;  %2538 = vmatpush3.msra.mxu0 %v3505_v23  ;;  %2703 = vpow2.f32 %v1802_v36 }
 0x3b3   :  { %v3514_v0 = vpop.eup %2679  ;;  %2539 = vmatprep.subr.mxu0 %v3670_v63  ;;  %2477 = vmatpush3.msra.mxu1 %v3509_v16  ;;  %2705 = vpow2.f32 %v1395_v31  ;;  %v3674_v31 = vld [vmem:[#allocation8_spill] sm:$0xff] }
 0x3b4   :  { %v3520_v44 = vpop.eup %2681  ;;  %2540 = vmatpush3.msra.mxu0 %v3497_v35  ;;  %2478 = vmatprep.subr.mxu1 %v3670_v63  ;;  %2707 = vpow2.f32 %v1800_v54  ;;  %v285_v15 = vadd.f32 %v3674_v31, %v124_v59  ;;  %v1932_v31 = vpop.permute.xlu1 %1931 }
 0x3b5   :  { %v3526_v38 = vpop.eup %2683  ;;  %2541 = vmatprep.subr.mxu0 %v3670_v63  ;;  %2479 = vmatpush3.msra.mxu1 %v3501_v19  ;;  %2709 = vpow2.f32 %v1393_v26  ;;  %v280_v26 = vadd.f32 %v3675_v53, %v119_v51 }
 0x3b6   :  { %v3532_v37 = vpop.eup %2685  ;;  %2542 = vmatpush3.msra.mxu0 %v3514_v0  ;;  %2480 = vmatprep.subr.mxu1 %v3670_v63  ;;  %2711 = vpow2.f32 %v1798_v42 }
 0x3b7   :  { %v3538_v58 = vpop.eup %2687  ;;  %2543 = vmatprep.subr.mxu0 %v3670_v63  ;;  %2481 = vmatpush3.msra.mxu1 %v3520_v44  ;;  %2713 = vpow2.f32 %v1391_v25 }
 0x3b8   :  { %v3544_v1 = vpop.eup %2689  ;;  %2544 = vmatpush3.msra.mxu0 %v3526_v38  ;;  %2482 = vmatprep.subr.mxu1 %v3670_v63  ;;  %2715 = vpow2.f32 %v1796_v49 }
 0x3b9   :  { %v3550_v8 = vpop.eup %2691  ;;  %2545 = vmatprep.subr.mxu0 %v3670_v63  ;;  %2483 = vmatpush3.msra.mxu1 %v3532_v37  ;;  %2717 = vpow2.f32 %v1389_v29 }
 0x3ba   :  { %v3556_v22 = vpop.eup %2693  ;;  %2546 = vmatpush3.msra.mxu0 %v3538_v58  ;;  %2484 = vmatprep.subr.mxu1 %v3670_v63  ;;  %2719 = vpow2.f32 %v1794_v52 }
 0x3bb   :  { %v3560_v18 = vpop.eup %2695  ;;  %2547 = vmatprep.subr.mxu0 %v3670_v63  ;;  %2485 = vmatpush3.msra.mxu1 %v3544_v1  ;;  %2721 = vpow2.f32 %v1387_v60 }
 0x3bc   :  { %v3564_v20 = vpop.eup %2697  ;;  %2548 = vmatpush3.msra.mxu0 %v3550_v8  ;;  %2486 = vmatprep.subr.mxu1 %v3670_v63  ;;  %2723 = vpow2.f32 %v1792_v4 }
 0x3bd   :  { %v3568_v32 = vpop.eup %2699  ;;  %2549 = vmatprep.subr.mxu0 %v3670_v63  ;;  %2487 = vmatpush3.msra.mxu1 %v3556_v22  ;;  %2725 = vpow2.f32 %v1385_v27 }
 0x3be   :  { %v3572_v13 = vpop.eup %2701  ;;  %2550 = vmatpush3.msra.mxu0 %v3560_v18  ;;  %2488 = vmatprep.subr.mxu1 %v3670_v63  ;;  %2727 = vpow2.f32 %v1790_v17 }
 0x3bf   :  { %v3576_v55 = vpop.eup %2703  ;;  %2551 = vmatprep.subr.mxu0 %v3670_v63  ;;  %2489 = vmatpush3.msra.mxu1 %v3564_v20  ;;  %2729 = vpow2.f32 %v1383_v24 }
 0x3c0   :  { %v3580_v48 = vpop.eup %2705  ;;  %2552 = vmatpush3.msra.mxu0 %v3568_v32  ;;  %2490 = vmatprep.subr.mxu1 %v3670_v63  ;;  %2731 = vpow2.f32 %v1788_v47 }
 0x3c1   :  { %v3584_v14 = vpop.eup %2707  ;;  %2553 = vmatprep.subr.mxu0 %v3670_v63  ;;  %2491 = vmatpush3.msra.mxu1 %v3572_v13  ;;  %2733 = vpow2.f32 %v1381_v43 }
 0x3c2   :  { %v2710_v3 = vpop.eup %2709  ;;  %2554 = vmatpush3.msra.mxu0 %v3576_v55  ;;  %2492 = vmatprep.subr.mxu1 %v3670_v63 }
 0x3c3   :  { %v2712_v12 = vpop.eup %2711  ;;  %2555 = vmatprep.subr.mxu0 %v3670_v63  ;;  %2493 = vmatpush3.msra.mxu1 %v3580_v48 }
 0x3c4   :  { %v2714_v50 = vpop.eup %2713  ;;  %2556 = vmatpush3.msra.mxu0 %v3584_v14  ;;  %2494 = vmatprep.subr.mxu1 %v3670_v63 }
 0x3c5   :  { %v2716_v56 = vpop.eup %2715  ;;  %2557 = vmatprep.subr.mxu0 %v3670_v63  ;;  %2495 = vmatpush3.msra.mxu1 %v2710_v3 }
 0x3c6   :  { %v2718_v41 = vpop.eup %2717  ;;  %2558 = vmatpush3.msra.mxu0 %v2712_v12  ;;  %2496 = vmatprep.subr.mxu1 %v3670_v63 }
 0x3c7   :  { %v2720_v6 = vpop.eup %2719  ;;  %2559 = vmatprep.subr.mxu0 %v3670_v63  ;;  %2497 = vmatpush3.msra.mxu1 %v2714_v50 }
 0x3c8   :  { %v2722_v11 = vpop.eup %2721  ;;  %2560 = vmatpush3.msra.mxu0 %v2716_v56  ;;  %2498 = vmatprep.subr.mxu1 %v3670_v63 }
 0x3c9   :  { %v2724_v2 = vpop.eup %2723  ;;  %2561 = vmatprep.subr.mxu0 %v3670_v63  ;;  %2499 = vmatpush3.msra.mxu1 %v2718_v41 }
 0x3ca   :  { %v2726_v34 = vpop.eup %2725  ;;  %2562 = vmatpush3.msra.mxu0 %v2720_v6  ;;  %2500 = vmatprep.subr.mxu1 %v3670_v63 }
 0x3cb   :  { %v2728_v40 = vpop.eup %2727  ;;  %2563 = vmatprep.subr.mxu0 %v3670_v63  ;;  %2501 = vmatpush3.msra.mxu1 %v2722_v11 }
 0x3cc   :  { %v2730_v39 = vpop.eup %2729  ;;  %2564 = vmatpush3.msra.mxu0 %v2724_v2  ;;  %2502 = vmatprep.subr.mxu1 %v3670_v63 }
 0x3cd   :  { %v2732_v33 = vpop.eup %2731  ;;  %2565 = vmatprep.subr.mxu0 %v3670_v63  ;;  %2503 = vmatpush3.msra.mxu1 %v2726_v34 }
 0x3ce   :  { %v2734_v36 = vpop.eup %2733  ;;  %2566 = vmatpush3.msra.mxu0 %v2728_v40  ;;  %2504 = vmatprep.subr.mxu1 %v3670_v63  ;;  %v1820_v30 = vadd.f32 %v2732_v33, %v2728_v40 }
 0x3cf   :  { %2567 = vmatprep.subr.mxu0 %v3670_v63  ;;  %2505 = vmatpush3.msra.mxu1 %v2730_v39  ;;  %v1413_v54 = vadd.f32 %v2734_v36, %v2730_v39 }
 0x3d0   :  { %2568 = vmatpush3.msra.mxu0 %v2732_v33  ;;  %2506 = vmatprep.subr.mxu1 %v3670_v63  ;;  %v1821_v61 = vadd.f32 %v2724_v2, %v1820_v30  ;;  %v1918_v30 = vld [vmem:[%s3657_s4 + $0x10] sm:$0xff] }
 0x3d1   :  { %2570 = vmatmul.mubr.f32.vlgmr.msra.gmra.mxu0 %v285_v15  ;;  %2507 = vmatpush3.msra.mxu1 %v2734_v36  ;;  %v1414_v42 = vadd.f32 %v2726_v34, %v1413_v54  ;;  %v1917_v36 = vld [vmem:[%s3657_s4 + $0x8] sm:$0xff]  ;;  %v1927_v15 = vpop.permute.xlu0 %1926 }
 0x3d2   :  { %2509 = vmatmul.mubr.f32.vlgmr.msra.gmra.mxu1 %v280_v26  ;;  %v1822_v45 = vadd.f32 %v2720_v6, %v1821_v61 }
 0x3d3   :  { %v1415_v25 = vadd.f32 %v2722_v11, %v1414_v42  ;;  %v1942_v42 = vpop.permute.xlu1 %1941 }
 0x3d4   :  { %v1823_v7 = vadd.f32 %v2716_v56, %v1822_v45 }
 0x3d5   :  { %v1416_v49 = vadd.f32 %v2718_v41, %v1415_v25  ;;  %v1937_v25 = vpop.permute.xlu0 %1936 }
 0x3d6   :  { %v1824_v57 = vadd.f32 %v2712_v12, %v1823_v7 }
 0x3d7   :  { %v1417_v29 = vadd.f32 %v2714_v50, %v1416_v49 }
 0x3d8   :  { %v1825_v9 = vadd.f32 %v3584_v14, %v1824_v57 }
 0x3d9   :  { %v1418_v52 = vadd.f32 %v2710_v3, %v1417_v29 }
 0x3da   :  { %v1826_v10 = vadd.f32 %v3576_v55, %v1825_v9 }
 0x3db   :  { %v1419_v60 = vadd.f32 %v3580_v48, %v1418_v52 }
 0x3dc   :  { %v1827_v63 = vadd.f32 %v3568_v32, %v1826_v10 }
 0x3dd   :  { %v1420_v28 = vadd.f32 %v3572_v13, %v1419_v60 }
 0x3de   :  { %v1828_v4 = vadd.f32 %v3560_v18, %v1827_v63 }
 0x3df   :  { %v1421_v62 = vadd.f32 %v3564_v20, %v1420_v28 }
 0x3e0   :  { %v1829_v27 = vadd.f32 %v3550_v8, %v1828_v4 }
 0x3e1   :  { %v1422_v46 = vadd.f32 %v3556_v22, %v1421_v62 }
 0x3e2   :  { %v1830_v17 = vadd.f32 %v3538_v58, %v1829_v27  ;;  %v1916_v58 = vld [vmem:[%s3657_s4] sm:$0xff] }
 0x3e3   :  { %v1423_v24 = vadd.f32 %v3544_v1, %v1422_v46  ;;  %2580 = vmatprep.mubr.msk.f32.mxu1 %vm126_vm0, %v1916_v58 }
 0x3e4   :  { %v1831_v47 = vadd.f32 %v3526_v38, %v1830_v17 }
 0x3e5   :  { %v1424_v43 = vadd.f32 %v3532_v37, %v1423_v24 }
 0x3e6   :  { %v1832_v32 = vadd.f32 %v3514_v0, %v1831_v47 }
 0x3e7   :  { %v1425_v13 = vadd.f32 %v3520_v44, %v1424_v43 }
 0x3e8   :  { %v1833_v18 = vadd.f32 %v3497_v35, %v1832_v32 }
 0x3e9   :  { %v1426_v20 = vadd.f32 %v3501_v19, %v1425_v13 }
 0x3ea   :  { %v1834_v8 = vadd.f32 %v3505_v23, %v1833_v18 }
 0x3eb   :  { %v1427_v22 = vadd.f32 %v3509_v16, %v1426_v20 }
 0x3ec   :  { %v1835_v38 = vrot.slane %v1834_v8, 4 }
 0x3ed   :  { %v1428_v37 = vrot.slane %v1427_v22, 4 }
 0x3ee   :  { %v1836_v1 = vadd.f32 %v1835_v38, %v1834_v8 }
 0x3ef   :  { %v1429_v0 = vadd.f32 %v1428_v37, %v1427_v22 }
 0x3f0   :  { %v1837_v55 = vrot.slane %v1836_v1, 2 }
 0x3f1   :  { %v1430_v44 = vrot.slane %v1429_v0, 2 }
 0x3f2   :  { %v1838_v48 = vadd.f32 %v1837_v55, %v1836_v1 }
 0x3f3   :  { %v1431_v35 = vadd.f32 %v1430_v44, %v1429_v0 }
 0x3f4   :  { %v1839_v14 = vrot.slane %v1838_v48, 1 }
 0x3f5   :  { %v1432_v19 = vrot.slane %v1431_v35, 1 }
 0x3f6   :  { %v1840_v3 = vadd.f32 %v1839_v14, %v1838_v48 }
 0x3f7   :  { %v1433_v23 = vadd.f32 %v1432_v19, %v1431_v35 }
 0x3f8   :  { %2735 = vrcp.f32 %v1840_v3 }
 0x3f9   :  { %2737 = vrcp.f32 %v1433_v23 }
 0x405   :  { %v2736_v16 = vpop.eup %2735 }
 0x406   :  { %v2738_v12 = vpop.eup %2737  ;;  %v1842_v50 = vmul.f32 %v2736_v16, %v1840_v3 }
 0x407   :  { %v1435_v56 = vmul.f32 %v2738_v12, %v1433_v23 }
 0x408   :  { %v1843_v41 = vsub.f32 2.0, %v1842_v50 }
 0x409   :  { %v1436_v6 = vsub.f32 2.0, %v1435_v56 }
 0x40a   :  { %v1844_v11 = vmul.f32 %v2736_v16, %v1843_v41 }
 0x40b   :  { %v1437_v34 = vmul.f32 %v2738_v12, %v1436_v6 }
 0x491   :  { %v1911_v2 = vpop.f32.mrf.mxu0 }
 0x492   :  { %v1915_v40 = vmul.f32 %v1911_v2, %v1844_v11  ;;  %v1504_v39 = vpop.f32.mrf.mxu1 }
 0x493   :  { %v1508_v59 = vmul.f32 %v1504_v39, %v1437_v34  ;;  %v2571_v33 = vpop.f32.mrf.mxu0 }
 0x494   :  { %2572 = vmatprep.subr.mxu1 %v1915_v40  ;;  %v2510_v51 = vpop.f32.mrf.mxu1 }
 0x495   :  { %2573 = vmatpush3.msra.mxu1 %v1915_v40 }
 0x496   :  { %2574 = vmatprep.subr.mxu1 %v1508_v59 }
 0x497   :  { %2575 = vmatpush3.msra.mxu1 %v1508_v59 }
 0x498   :  { %2576 = vmatprep.subr.mxu1 %v3375_v21 }
 0x499   :  { %2577 = vmatpush3.msra.mxu1 %v3375_v21  ;;  %v1919_v21 = vld [vmem:[%s3657_s4 + $0x18] sm:$0xff]  ;;  %s2759_s4 = scalar_lea.vmem %s2051_s0, 512 }
 0x49a   :  { %2578 = vmatprep.subr.mxu1 %v3377_v5  ;;  %p2760_p5 = scmp.ne.s32.totalorder %s2051_s0, %s2759_s4  ;;  %p2765_p7 = scmp.lt.s32.totalorder %s2759_s4, %s2759_s4 }
 0x49b   :  { %2579 = vmatpush3.msra.mxu1 %v3377_v5 }
 0x49c   :  { %2581 = vmatmul.mubr.msk.f32.vlgmr.msra.gmra.mxu1 %vm126_vm0, %v1917_v36  ;;  %p2766_p8 = por %p2765_p7, %p2764_p6 }
 0x49d   :  { %2583 = vmatprep.mubr.msk.f32.mxu1 %vm126_vm0, %v1918_v30 }
 0x49e   :  { %p2767_p9 = pnand %p2766_p8, %p2760_p5 }
 0x4a0   :  { %2584 = vmatmul.mubr.msk.f32.gmra.mxu1 %vm126_vm0, %v1919_v21 }
 0x55c   :  { %v2582_v54 = vpop.f32.mrf.mxu1 }
 0x55d   :  { %v2028_v53 = vadd.f32 %v2582_v54, %v1932_v31 }
 0x55e   :  { %v2022_v26 = vpop.f32.mrf.mxu1 }
 0x55f   :  { %2042 = vst [vmem:[#allocation5 + $0x8] sm:$0xff] %v2028_v53  ;;  %v2023_v61 = vadd.f32 %v2022_v26, %v1927_v15 }
 0x560   :  { %v2585_v45 = vpop.f32.mrf.mxu1 }
 0x561   :  { %2041 = vst [vmem:[#allocation5] sm:$0xff] %v2023_v61  ;;  %v2038_v5 = vadd.f32 %v2585_v45, %v1942_v42 }
 0x562   :  { %v2032_v7 = vpop.f32.mrf.mxu1 }
 0x563   :  { %2044 = vst [vmem:[#allocation5 + $0x18] sm:$0xff] %v2038_v5  ;;  %v2033_v49 = vadd.f32 %v2032_v7, %v1937_v25 }
 0x565   :  { %2043 = vst [vmem:[#allocation5 + $0x10] sm:$0xff] %v2033_v49 }
 0x566   :  { %2770 = shalt.err (!%p2767_p9)
}
 0x567   :  { %2056 = dma.vmem_to_hbm [thread:$0]  %s2051_s0, 512, %s3659_s6, [#allocation4], %s2784_s24, %s2784_s24, %s2785_s25  }
 0x568   :  { %2781 = dma.done.wait [#allocation4], 512  }
 0x569   :  { %2782 = vsyncadd [#allocation4], 4294966784 }
 0x56a   :  { %2060 = vsyncpa [#allocation3], 1 }
 0x56b   :  { %2061 = vsyncpa [#allocation4], 1 }

</bundles_post_ra>
